<compile_context>
chip_gen: v7x
topology: tpu7x:2x2x1
jax: 0.10.0
libtpu: 0.0.40
codegen_flags: <defaults>
</compile_context>

<pallas_src>
import functools

import jax
import jax.numpy as jnp
from jax.experimental import pallas as pl
from jax.experimental.pallas import tpu as pltpu


def _round_up(v, m):
    return (v + m - 1) // m * m


# ---------------------------------------------------------------------------
# Fused InvertedResidual kernel (one grid step per batch image, NHWC).
# ---------------------------------------------------------------------------
def _fused_ir_kernel(*refs, H, W, Ho, Wo, stride, expand, use_res):
    if expand:
        (x_ref, we_ref, be_ref, dw_ref, bd_ref, wp_ref, bp_ref,
         o_ref, ybuf_ref) = refs
    else:
        (x_ref, dw_ref, bd_ref, wp_ref, bp_ref, o_ref, ybuf_ref) = refs

    cin = x_ref.shape[-1]
    cout = o_ref.shape[-1]
    hidp = ybuf_ref.shape[-1]

    # Halo buffer: zero it, then fill the interior with the (expanded)
    # activation.  The zero border implements the depthwise conv's 1-pixel
    # zero padding without any HBM pad pass.  Zeroing every step keeps the
    # kernel correct when the batch axis is sharded across TensorCores
    # (each core owns a private scratch); the cost is ~50 vector stores.
    ybuf_ref[...] = jnp.zeros_like(ybuf_ref)

    x = x_ref[0]  # (H, W, cin)

    if expand:
        # 1x1 expand conv (+ folded BN) + ReLU6 on the MXU.
        # NOTE: in-kernel reshapes keep the lane (channel) axis fixed and only
        # merge/split leading dims (W is a multiple of 8 here -> cheap).
        x2d = x.reshape(H * W, cin)
        y = jnp.dot(x2d, we_ref[...], preferred_element_type=jnp.float32)
        y = jnp.clip(y + be_ref[...], 0.0, 6.0)            # (H*W, hidp)
        ybuf_ref[pl.ds(1, H), pl.ds(1, W), :] = (
            y.reshape(H, W, hidp).astype(ybuf_ref.dtype))
    else:
        ybuf_ref[pl.ds(1, H), pl.ds(1, W), :] = x.astype(ybuf_ref.dtype)

    # 3x3 depthwise conv (+ folded BN) + ReLU6: 9 shifted windows read
    # directly from the halo buffer (strided ref loads for stride=2; no
    # value-level slice copies).
    wdw = dw_ref[...]                                       # (3, 3, hidp)
    acc = jnp.zeros((Ho, Wo, hidp), jnp.float32)
    for kh in range(3):
        for kw in range(3):
            if stride == 1:
                patch = ybuf_ref[pl.ds(kh, Ho), pl.ds(kw, Wo), :]
            else:
                patch = ybuf_ref[pl.ds(kh, Ho, stride=stride),
                                 pl.ds(kw, Wo, stride=stride), :]
            acc = acc + patch.astype(jnp.float32) * wdw[kh, kw].astype(jnp.float32)
    z = jnp.clip(acc + bd_ref[...], 0.0, 6.0)               # (Ho, Wo, hidp)

    # 1x1 projection (+ folded BN) on the MXU; residual add fused.
    out = jnp.dot(z.reshape(Ho * Wo, hidp), wp_ref[...],
                  preferred_element_type=jnp.float32)
    out = out + bp_ref[...]
    if use_res:
        out = out + x.reshape(H * W, cin).astype(jnp.float32)
    o_ref[0] = out.reshape(Ho, Wo, cout).astype(o_ref.dtype)


def inverted_residual_nhwc(x_nhwc, params, *, stride, expand_ratio):
    """Fused InvertedResidual forward.  NHWC in / NHWC out (preferred)."""
    n, h, w, cin = x_nhwc.shape
    oup = params["proj_w"].shape[1]
    hidden = params["dw_w"].shape[-1]
    expand = expand_ratio != 1
    use_res = (stride == 1) and (cin == oup)
    ho = (h - 1) // stride + 1
    wo = (w - 1) // stride + 1

    # Lane-dense hidden width: pad the (tiny) weights/biases once so every
    # in-kernel intermediate has a multiple-of-128 channel axis.
    hidp = _round_up(hidden, 128) if expand else hidden
    pad_c = hidp - hidden

    dw_w = jnp.pad(params["dw_w"], ((0, 0), (0, 0), (0, pad_c)))
    dw_b = jnp.pad(params["dw_b"], (0, pad_c)).reshape(1, 1, hidp)
    wp = jnp.pad(params["proj_w"], ((0, pad_c), (0, 0)))
    bp = params["proj_b"].reshape(1, oup)

    args = [x_nhwc]
    in_specs = [pl.BlockSpec((1, h, w, cin), lambda i: (i, 0, 0, 0))]
    if expand:
        we = jnp.pad(params["expand_w"], ((0, 0), (0, pad_c)))
        be = jnp.pad(params["expand_b"], (0, pad_c)).reshape(1, hidp)
        args += [we, be]
        in_specs += [pl.BlockSpec((cin, hidp), lambda i: (0, 0)),
                     pl.BlockSpec((1, hidp), lambda i: (0, 0))]
    args += [dw_w, dw_b, wp, bp]
    in_specs += [pl.BlockSpec((3, 3, hidp), lambda i: (0, 0, 0)),
                 pl.BlockSpec((1, 1, hidp), lambda i: (0, 0, 0)),
                 pl.BlockSpec((hidp, oup), lambda i: (0, 0)),
                 pl.BlockSpec((1, oup), lambda i: (0, 0))]

    kernel = functools.partial(
        _fused_ir_kernel, H=h, W=w, Ho=ho, Wo=wo,
        stride=stride, expand=expand, use_res=use_res)

    return pl.pallas_call(
        kernel,
        out_shape=jax.ShapeDtypeStruct((n, ho, wo, oup), x_nhwc.dtype),
        grid_spec=pltpu.PrefetchScalarGridSpec(
            num_scalar_prefetch=0,
            grid=(n,),
            in_specs=in_specs,
            out_specs=pl.BlockSpec((1, ho, wo, oup), lambda i: (i, 0, 0, 0)),
            scratch_shapes=[pltpu.VMEM((h + 2, w + 2, hidp), jnp.float32)],
        ),
        compiler_params=pltpu.CompilerParams(
            dimension_semantics=("parallel",)),
    )(*args)


def inverted_residual(x_nchw, params, *, stride, expand_ratio):
    """PyTorch-parity wrapper: NCHW in / NCHW out (transpose only at the
    network boundary; keep NHWC end-to-end when stacking blocks)."""
    x = jnp.transpose(x_nchw, (0, 2, 3, 1))
    out = inverted_residual_nhwc(x, params, stride=stride,
                                 expand_ratio=expand_ratio)
    return jnp.transpose(out, (0, 3, 1, 2))


# ---------------------------------------------------------------------------
# Deterministic parameter construction (Conv weights + folded BatchNorm).
# ---------------------------------------------------------------------------
def make_params(key, inp, oup, expand_ratio, eps=1e-5):
    hidden = int(round(inp * expand_ratio))
    ks = jax.random.split(key, 6)

    def bn(k, c):
        k1, k2, k3, k4 = jax.random.split(k, 4)
        gamma = 1.0 + 0.1 * jax.random.normal(k1, (c,), jnp.float32)
        beta = 0.1 * jax.random.normal(k2, (c,), jnp.float32)
        mean = 0.1 * jax.random.normal(k3, (c,), jnp.float32)
        var = 0.5 + jax.random.uniform(k4, (c,), jnp.float32)
        scale = gamma / jnp.sqrt(var + eps)
        return scale, beta - mean * scale

    params = {}
    if expand_ratio != 1:
        w = 0.1 * jax.random.normal(ks[0], (inp, hidden), jnp.float32)   # (Cin, Cout)
        s, b = bn(ks[1], hidden)
        params["expand_w"] = w * s
        params["expand_b"] = b

    wd = 0.1 * jax.random.normal(ks[2], (3, 3, hidden), jnp.float32)      # HWC
    s, b = bn(ks[3], hidden)
    params["dw_w"] = wd * s
    params["dw_b"] = b

    wp = 0.1 * jax.random.normal(ks[4], (hidden, oup), jnp.float32)       # (Cin, Cout)
    s, b = bn(ks[5], oup)
    params["proj_w"] = wp * s
    params["proj_b"] = b
    return params


# Pure-JAX reference (same folded params) for a correctness check.
def ref_inverted_residual(x_nchw, params, *, stride, expand_ratio):
    n, cin, h, w = x_nchw.shape
    oup = params["proj_w"].shape[1]
    use_res = (stride == 1) and (cin == oup)
    x = jnp.transpose(x_nchw, (0, 2, 3, 1))

    hcur = x
    if expand_ratio != 1:
        hcur = jnp.clip(
            jnp.einsum("nhwc,cd->nhwd", hcur, params["expand_w"]) + params["expand_b"],
            0.0, 6.0)

    c = hcur.shape[-1]
    dw = params["dw_w"][:, :, None, :]  # HWIO, I=1 (depthwise)
    y = jax.lax.conv_general_dilated(
        hcur, dw, window_strides=(stride, stride), padding=((1, 1), (1, 1)),
        dimension_numbers=("NHWC", "HWIO", "NHWC"), feature_group_count=c)
    hcur = jnp.clip(y + params["dw_b"], 0.0, 6.0)

    out = jnp.einsum("nhwc,cd->nhwd", hcur, params["proj_w"]) + params["proj_b"]
    if use_res:
        out = out + x
    return jnp.transpose(out, (0, 3, 1, 2))


if __name__ == "__main__":
    key = jax.random.PRNGKey(0)
    n, h, w = 2, 16, 16

    configs = [
        # (inp, oup, stride, expand_ratio)
        (8, 8, 1, 4),    # residual path (stride=1, inp==oup), with expand
        (8, 16, 1, 4),   # no residual (inp != oup)
        (8, 8, 1, 1),    # expand_ratio == 1 path (no expand conv), residual
    ]

    for inp, oup, stride, expand_ratio in configs:
        kx, kp, key = jax.random.split(key, 3)
        x = jax.random.normal(kx, (n, inp, h, w), jnp.float32)  # NCHW like PyTorch
        params = make_params(kp, inp, oup, expand_ratio)

        out = inverted_residual(x, params, stride=stride, expand_ratio=expand_ratio)
        out = jax.block_until_ready(out)

        ref = ref_inverted_residual(x, params, stride=stride,
                                    expand_ratio=expand_ratio)
        ho = (h - 1) // stride + 1
        wo = (w - 1) // stride + 1
        assert out.shape == (n, oup, ho, wo)
        assert jnp.allclose(out, ref, atol=1e-4, rtol=1e-4)

    print("KERNEL_OK")
</pallas_src>

<mosaic_0001>
module attributes {stable_mosaic.version = 11 : i64} {
  func.func @_fused_ir_kernel(%arg0: i32, %arg1: memref<1x16x16x8xf32, #tpu.memory_space<vmem>>, %arg2: memref<8x128xf32, #tpu.memory_space<vmem>>, %arg3: memref<1x128xf32, #tpu.memory_space<vmem>>, %arg4: memref<3x3x128xf32, #tpu.memory_space<vmem>>, %arg5: memref<1x1x128xf32, #tpu.memory_space<vmem>>, %arg6: memref<128x8xf32, #tpu.memory_space<vmem>>, %arg7: memref<1x8xf32, #tpu.memory_space<vmem>>, %arg8: memref<1x16x16x8xf32, #tpu.memory_space<vmem>>, %arg9: memref<18x18x128xf32, #tpu.memory_space<vmem>>) attributes {dimension_semantics = [#tpu.dimension_semantics<parallel>], iteration_bounds = array<i64: 2>, scalar_prefetch = 0 : i64, scratch_operands = 1 : i64, tpu.core_type = #tpu.core_type<tc>, window_params = [{transform_indices = @transform_0, window_bounds = array<i64: 1, 16, 16, 8>}, {pipeline_mode = #tpu.pipeline_mode<synchronous>, transform_indices = @transform_1, window_bounds = array<i64: 8, 128>}, {pipeline_mode = #tpu.pipeline_mode<synchronous>, transform_indices = @transform_2, window_bounds = array<i64: 1, 128>}, {pipeline_mode = #tpu.pipeline_mode<synchronous>, transform_indices = @transform_3, window_bounds = array<i64: 3, 3, 128>}, {pipeline_mode = #tpu.pipeline_mode<synchronous>, transform_indices = @transform_4, window_bounds = array<i64: 1, 1, 128>}, {pipeline_mode = #tpu.pipeline_mode<synchronous>, transform_indices = @transform_5, window_bounds = array<i64: 128, 8>}, {pipeline_mode = #tpu.pipeline_mode<synchronous>, transform_indices = @transform_6, window_bounds = array<i64: 1, 8>}, {transform_indices = @transform_7, window_bounds = array<i64: 1, 16, 16, 8>}]} {
    %cst = arith.constant 0.000000e+00 : f32
    %0 = vector.broadcast %cst : f32 to vector<18x18x128xf32>
    %c0 = arith.constant 0 : index
    %c0_0 = arith.constant 0 : index
    %c0_1 = arith.constant 0 : index
    %1 = vector.load %arg9[%c0, %c0_0, %c0_1] : memref<18x18x128xf32, #tpu.memory_space<vmem>>, vector<18x18x128xf32>
    tpu.vector_store %arg9[%c0, %c0_0, %c0_1], %0 {strides = array<i32>} : memref<18x18x128xf32, #tpu.memory_space<vmem>>, vector<18x18x128xf32>,
    %c0_2 = arith.constant 0 : index
    %c0_3 = arith.constant 0 : index
    %c0_4 = arith.constant 0 : index
    %c0_5 = arith.constant 0 : index
    %2 = vector.load %arg1[%c0_2, %c0_3, %c0_4, %c0_5] : memref<1x16x16x8xf32, #tpu.memory_space<vmem>>, vector<1x16x16x8xf32>
    %3 = vector.shape_cast %2 : vector<1x16x16x8xf32> to vector<16x16x8xf32>
    %4 = vector.shape_cast %3 : vector<16x16x8xf32> to vector<256x8xf32>
    %c0_6 = arith.constant 0 : index
    %c0_7 = arith.constant 0 : index
    %5 = vector.load %arg2[%c0_6, %c0_7] : memref<8x128xf32, #tpu.memory_space<vmem>>, vector<8x128xf32>
    %cst_8 = arith.constant dense<0.000000e+00> : vector<256x128xf32>
    %6 = tpu.matmul %4, %5, %cst_8 {dimension_numbers = #tpu.dot_dimension_numbers<[1], [0], [0], [1], [0, 0, 1, 1], [], []>} : vector<256x8xf32>, vector<8x128xf32>, vector<256x128xf32> -> vector<256x128xf32>
    %c0_9 = arith.constant 0 : index
    %c0_10 = arith.constant 0 : index
    %7 = vector.load %arg3[%c0_9, %c0_10] : memref<1x128xf32, #tpu.memory_space<vmem>>, vector<1x128xf32>
    %8 = vector.broadcast %7 : vector<1x128xf32> to vector<256x128xf32>
    %9 = arith.addf %6, %8 : vector<256x128xf32>
    %cst_11 = arith.constant 0.000000e+00 : f32
    %cst_12 = arith.constant 6.000000e+00 : f32
    %10 = vector.broadcast %cst_11 : f32 to vector<256x128xf32>
    %11 = arith.maximumf %10, %9 : vector<256x128xf32>
    %12 = vector.broadcast %cst_12 : f32 to vector<256x128xf32>
    %13 = arith.minimumf %12, %11 : vector<256x128xf32>
    %14 = vector.shape_cast %13 : vector<256x128xf32> to vector<16x16x128xf32>
    %c1 = arith.constant 1 : index
    %c1_13 = arith.constant 1 : index
    %c0_14 = arith.constant 0 : index
    %15 = vector.load %arg9[%c1, %c1_13, %c0_14] : memref<18x18x128xf32, #tpu.memory_space<vmem>>, vector<16x16x128xf32>
    tpu.vector_store %arg9[%c1, %c1_13, %c0_14], %14 {strides = array<i32>} : memref<18x18x128xf32, #tpu.memory_space<vmem>>, vector<16x16x128xf32>,
    %c0_15 = arith.constant 0 : index
    %c0_16 = arith.constant 0 : index
    %c0_17 = arith.constant 0 : index
    %16 = vector.load %arg4[%c0_15, %c0_16, %c0_17] : memref<3x3x128xf32, #tpu.memory_space<vmem>>, vector<3x3x128xf32>
    %cst_18 = arith.constant 0.000000e+00 : f32
    %17 = vector.broadcast %cst_18 : f32 to vector<16x16x128xf32>
    %c0_19 = arith.constant 0 : index
    %c0_20 = arith.constant 0 : index
    %c0_21 = arith.constant 0 : index
    %18 = vector.load %arg9[%c0_19, %c0_20, %c0_21] : memref<18x18x128xf32, #tpu.memory_space<vmem>>, vector<16x16x128xf32>
    %19 = vector.extract_strided_slice %16 {offsets = [0, 0, 0], sizes = [1, 1, 128], strides = [1, 1, 1]} : vector<3x3x128xf32> to vector<1x1x128xf32>
    %20 = vector.shape_cast %19 : vector<1x1x128xf32> to vector<128xf32>
    %21 = vector.shape_cast %20 : vector<128xf32> to vector<1x1x128xf32>
    %22 = vector.broadcast %21 : vector<1x1x128xf32> to vector<16x16x128xf32>
    %23 = arith.mulf %18, %22 : vector<16x16x128xf32>
    %24 = arith.addf %17, %23 : vector<16x16x128xf32>
    %c0_22 = arith.constant 0 : index
    %c1_23 = arith.constant 1 : index
    %c0_24 = arith.constant 0 : index
    %25 = vector.load %arg9[%c0_22, %c1_23, %c0_24] : memref<18x18x128xf32, #tpu.memory_space<vmem>>, vector<16x16x128xf32>
    %26 = vector.extract_strided_slice %16 {offsets = [0, 1, 0], sizes = [1, 1, 128], strides = [1, 1, 1]} : vector<3x3x128xf32> to vector<1x1x128xf32>
    %27 = vector.shape_cast %26 : vector<1x1x128xf32> to vector<128xf32>
    %28 = vector.shape_cast %27 : vector<128xf32> to vector<1x1x128xf32>
    %29 = vector.broadcast %28 : vector<1x1x128xf32> to vector<16x16x128xf32>
    %30 = arith.mulf %25, %29 : vector<16x16x128xf32>
    %31 = arith.addf %24, %30 : vector<16x16x128xf32>
    %c0_25 = arith.constant 0 : index
    %c2 = arith.constant 2 : index
    %c0_26 = arith.constant 0 : index
    %32 = vector.load %arg9[%c0_25, %c2, %c0_26] : memref<18x18x128xf32, #tpu.memory_space<vmem>>, vector<16x16x128xf32>
    %33 = vector.extract_strided_slice %16 {offsets = [0, 2, 0], sizes = [1, 1, 128], strides = [1, 1, 1]} : vector<3x3x128xf32> to vector<1x1x128xf32>
    %34 = vector.shape_cast %33 : vector<1x1x128xf32> to vector<128xf32>
    %35 = vector.shape_cast %34 : vector<128xf32> to vector<1x1x128xf32>
    %36 = vector.broadcast %35 : vector<1x1x128xf32> to vector<16x16x128xf32>
    %37 = arith.mulf %32, %36 : vector<16x16x128xf32>
    %38 = arith.addf %31, %37 : vector<16x16x128xf32>
    %c1_27 = arith.constant 1 : index
    %c0_28 = arith.constant 0 : index
    %c0_29 = arith.constant 0 : index
    %39 = vector.load %arg9[%c1_27, %c0_28, %c0_29] : memref<18x18x128xf32, #tpu.memory_space<vmem>>, vector<16x16x128xf32>
    %40 = vector.extract_strided_slice %16 {offsets = [1, 0, 0], sizes = [1, 1, 128], strides = [1, 1, 1]} : vector<3x3x128xf32> to vector<1x1x128xf32>
    %41 = vector.shape_cast %40 : vector<1x1x128xf32> to vector<128xf32>
    %42 = vector.shape_cast %41 : vector<128xf32> to vector<1x1x128xf32>
    %43 = vector.broadcast %42 : vector<1x1x128xf32> to vector<16x16x128xf32>
    %44 = arith.mulf %39, %43 : vector<16x16x128xf32>
    %45 = arith.addf %38, %44 : vector<16x16x128xf32>
    %c1_30 = arith.constant 1 : index
    %c1_31 = arith.constant 1 : index
    %c0_32 = arith.constant 0 : index
    %46 = vector.load %arg9[%c1_30, %c1_31, %c0_32] : memref<18x18x128xf32, #tpu.memory_space<vmem>>, vector<16x16x128xf32>
    %47 = vector.extract_strided_slice %16 {offsets = [1, 1, 0], sizes = [1, 1, 128], strides = [1, 1, 1]} : vector<3x3x128xf32> to vector<1x1x128xf32>
    %48 = vector.shape_cast %47 : vector<1x1x128xf32> to vector<128xf32>
    %49 = vector.shape_cast %48 : vector<128xf32> to vector<1x1x128xf32>
    %50 = vector.broadcast %49 : vector<1x1x128xf32> to vector<16x16x128xf32>
    %51 = arith.mulf %46, %50 : vector<16x16x128xf32>
    %52 = arith.addf %45, %51 : vector<16x16x128xf32>
    %c1_33 = arith.constant 1 : index
    %c2_34 = arith.constant 2 : index
    %c0_35 = arith.constant 0 : index
    %53 = vector.load %arg9[%c1_33, %c2_34, %c0_35] : memref<18x18x128xf32, #tpu.memory_space<vmem>>, vector<16x16x128xf32>
    %54 = vector.extract_strided_slice %16 {offsets = [1, 2, 0], sizes = [1, 1, 128], strides = [1, 1, 1]} : vector<3x3x128xf32> to vector<1x1x128xf32>
    %55 = vector.shape_cast %54 : vector<1x1x128xf32> to vector<128xf32>
    %56 = vector.shape_cast %55 : vector<128xf32> to vector<1x1x128xf32>
    %57 = vector.broadcast %56 : vector<1x1x128xf32> to vector<16x16x128xf32>
    %58 = arith.mulf %53, %57 : vector<16x16x128xf32>
    %59 = arith.addf %52, %58 : vector<16x16x128xf32>
    %c2_36 = arith.constant 2 : index
    %c0_37 = arith.constant 0 : index
    %c0_38 = arith.constant 0 : index
    %60 = vector.load %arg9[%c2_36, %c0_37, %c0_38] : memref<18x18x128xf32, #tpu.memory_space<vmem>>, vector<16x16x128xf32>
    %61 = vector.extract_strided_slice %16 {offsets = [2, 0, 0], sizes = [1, 1, 128], strides = [1, 1, 1]} : vector<3x3x128xf32> to vector<1x1x128xf32>
    %62 = vector.shape_cast %61 : vector<1x1x128xf32> to vector<128xf32>
    %63 = vector.shape_cast %62 : vector<128xf32> to vector<1x1x128xf32>
    %64 = vector.broadcast %63 : vector<1x1x128xf32> to vector<16x16x128xf32>
    %65 = arith.mulf %60, %64 : vector<16x16x128xf32>
    %66 = arith.addf %59, %65 : vector<16x16x128xf32>
    %c2_39 = arith.constant 2 : index
    %c1_40 = arith.constant 1 : index
    %c0_41 = arith.constant 0 : index
    %67 = vector.load %arg9[%c2_39, %c1_40, %c0_41] : memref<18x18x128xf32, #tpu.memory_space<vmem>>, vector<16x16x128xf32>
    %68 = vector.extract_strided_slice %16 {offsets = [2, 1, 0], sizes = [1, 1, 128], strides = [1, 1, 1]} : vector<3x3x128xf32> to vector<1x1x128xf32>
    %69 = vector.shape_cast %68 : vector<1x1x128xf32> to vector<128xf32>
    %70 = vector.shape_cast %69 : vector<128xf32> to vector<1x1x128xf32>
    %71 = vector.broadcast %70 : vector<1x1x128xf32> to vector<16x16x128xf32>
    %72 = arith.mulf %67, %71 : vector<16x16x128xf32>
    %73 = arith.addf %66, %72 : vector<16x16x128xf32>
    %c2_42 = arith.constant 2 : index
    %c2_43 = arith.constant 2 : index
    %c0_44 = arith.constant 0 : index
    %74 = vector.load %arg9[%c2_42, %c2_43, %c0_44] : memref<18x18x128xf32, #tpu.memory_space<vmem>>, vector<16x16x128xf32>
    %75 = vector.extract_strided_slice %16 {offsets = [2, 2, 0], sizes = [1, 1, 128], strides = [1, 1, 1]} : vector<3x3x128xf32> to vector<1x1x128xf32>
    %76 = vector.shape_cast %75 : vector<1x1x128xf32> to vector<128xf32>
    %77 = vector.shape_cast %76 : vector<128xf32> to vector<1x1x128xf32>
    %78 = vector.broadcast %77 : vector<1x1x128xf32> to vector<16x16x128xf32>
    %79 = arith.mulf %74, %78 : vector<16x16x128xf32>
    %80 = arith.addf %73, %79 : vector<16x16x128xf32>
    %c0_45 = arith.constant 0 : index
    %c0_46 = arith.constant 0 : index
    %c0_47 = arith.constant 0 : index
    %81 = vector.load %arg5[%c0_45, %c0_46, %c0_47] : memref<1x1x128xf32, #tpu.memory_space<vmem>>, vector<1x1x128xf32>
    %82 = vector.broadcast %81 : vector<1x1x128xf32> to vector<16x16x128xf32>
    %83 = arith.addf %80, %82 : vector<16x16x128xf32>
    %cst_48 = arith.constant 0.000000e+00 : f32
    %cst_49 = arith.constant 6.000000e+00 : f32
    %84 = vector.broadcast %cst_48 : f32 to vector<16x16x128xf32>
    %85 = arith.maximumf %84, %83 : vector<16x16x128xf32>
    %86 = vector.broadcast %cst_49 : f32 to vector<16x16x128xf32>
    %87 = arith.minimumf %86, %85 : vector<16x16x128xf32>
    %88 = vector.shape_cast %87 : vector<16x16x128xf32> to vector<256x128xf32>
    %c0_50 = arith.constant 0 : index
    %c0_51 = arith.constant 0 : index
    %89 = vector.load %arg6[%c0_50, %c0_51] : memref<128x8xf32, #tpu.memory_space<vmem>>, vector<128x8xf32>
    %cst_52 = arith.constant dense<0.000000e+00> : vector<256x8xf32>
    %90 = tpu.matmul %88, %89, %cst_52 {dimension_numbers = #tpu.dot_dimension_numbers<[1], [0], [0], [1], [0, 0, 1, 1], [], []>} : vector<256x128xf32>, vector<128x8xf32>, vector<256x8xf32> -> vector<256x8xf32>
    %c0_53 = arith.constant 0 : index
    %c0_54 = arith.constant 0 : index
    %91 = vector.load %arg7[%c0_53, %c0_54] : memref<1x8xf32, #tpu.memory_space<vmem>>, vector<1x8xf32>
    %92 = vector.broadcast %91 : vector<1x8xf32> to vector<256x8xf32>
    %93 = arith.addf %90, %92 : vector<256x8xf32>
    %94 = vector.shape_cast %3 : vector<16x16x8xf32> to vector<256x8xf32>
    %95 = arith.addf %93, %94 : vector<256x8xf32>
    %96 = vector.shape_cast %95 : vector<256x8xf32> to vector<16x16x8xf32>
    %c0_55 = arith.constant 0 : index
    %c0_56 = arith.constant 0 : index
    %c0_57 = arith.constant 0 : index
    %c0_58 = arith.constant 0 : index
    %97 = vector.load %arg8[%c0_55, %c0_56, %c0_57, %c0_58] : memref<1x16x16x8xf32, #tpu.memory_space<vmem>>, vector<1x16x16x8xf32>
    %98 = vector.shape_cast %97 : vector<1x16x16x8xf32> to vector<16x16x8xf32>
    %99 = vector.shape_cast %96 : vector<16x16x8xf32> to vector<1x16x16x8xf32>
    tpu.vector_store %arg8[%c0_55, %c0_56, %c0_57, %c0_58], %99 {strides = array<i32>} : memref<1x16x16x8xf32, #tpu.memory_space<vmem>>, vector<1x16x16x8xf32>,
    return
  }
  func.func @transform_0(%arg0: i32) -> (i32, i32, i32, i32) {
    %c0_i32 = arith.constant 0 : i32
    %c0_i32_0 = arith.constant 0 : i32
    %c0_i32_1 = arith.constant 0 : i32
    %c0_i32_2 = arith.constant 0 : i32
    return %arg0, %c0_i32, %c0_i32_0, %c0_i32_1 : i32, i32, i32, i32
  }
  func.func @transform_1(%arg0: i32) -> (i32, i32) {
    %c0_i32 = arith.constant 0 : i32
    %c0_i32_0 = arith.constant 0 : i32
    %c0_i32_1 = arith.constant 0 : i32
    return %c0_i32, %c0_i32_0 : i32, i32
  }
  func.func @transform_2(%arg0: i32) -> (i32, i32) {
    %c0_i32 = arith.constant 0 : i32
    %c0_i32_0 = arith.constant 0 : i32
    %c0_i32_1 = arith.constant 0 : i32
    return %c0_i32, %c0_i32_0 : i32, i32
  }
  func.func @transform_3(%arg0: i32) -> (i32, i32, i32) {
    %c0_i32 = arith.constant 0 : i32
    %c0_i32_0 = arith.constant 0 : i32
    %c0_i32_1 = arith.constant 0 : i32
    %c0_i32_2 = arith.constant 0 : i32
    return %c0_i32, %c0_i32_0, %c0_i32_1 : i32, i32, i32
  }
  func.func @transform_4(%arg0: i32) -> (i32, i32, i32) {
    %c0_i32 = arith.constant 0 : i32
    %c0_i32_0 = arith.constant 0 : i32
    %c0_i32_1 = arith.constant 0 : i32
    %c0_i32_2 = arith.constant 0 : i32
    return %c0_i32, %c0_i32_0, %c0_i32_1 : i32, i32, i32
  }
  func.func @transform_5(%arg0: i32) -> (i32, i32) {
    %c0_i32 = arith.constant 0 : i32
    %c0_i32_0 = arith.constant 0 : i32
    %c0_i32_1 = arith.constant 0 : i32
    return %c0_i32, %c0_i32_0 : i32, i32
  }
  func.func @transform_6(%arg0: i32) -> (i32, i32) {
    %c0_i32 = arith.constant 0 : i32
    %c0_i32_0 = arith.constant 0 : i32
    %c0_i32_1 = arith.constant 0 : i32
    return %c0_i32, %c0_i32_0 : i32, i32
  }
  func.func @transform_7(%arg0: i32) -> (i32, i32, i32, i32) {
    %c0_i32 = arith.constant 0 : i32
    %c0_i32_0 = arith.constant 0 : i32
    %c0_i32_1 = arith.constant 0 : i32
    %c0_i32_2 = arith.constant 0 : i32
    return %arg0, %c0_i32, %c0_i32_0, %c0_i32_1 : i32, i32, i32, i32
  }
}

</mosaic_0001>

<bundles_post_ra>
// kernel: tpu_custom_call.1
= control target key start
LH: loop header
LB: loop body
LE: loop exit
PB: predicated region body
PF: predicated region fallthrough
CT: control target
= control target key end

     0   :  { %s2565_s24 = smov 0   ;;  %s3700_s0 = inlined_call_operand.vmem [shape: f32[2,16,16,8], index: 0, kind: input, shape index: {}]   ;;  %s3701_s1 = inlined_call_operand.vmem [shape: f32[8,128], index: 1, kind: input, shape index: {}]   ;;  %s3702_s2 = inlined_call_operand.vmem [shape: f32[1,128], index: 2, kind: input, shape index: {}]   ;;  %s3703_s3 = inlined_call_operand.vmem [shape: f32[3,3,128], index: 3, kind: input, shape index: {}]   ;;  %s3704_s4 = inlined_call_operand.vmem [shape: f32[1,1,128], index: 4, kind: input, shape index: {}]   ;;  %s3705_s5 = inlined_call_operand.vmem [shape: f32[128,8], index: 5, kind: input, shape index: {}]   ;;  %s3706_s6 = inlined_call_operand.vmem [shape: f32[1,8], index: 6, kind: input, shape index: {}]   ;;  %s3707_s7 = inlined_call_operand.vmem [shape: f32[2,16,16,8], index: 7, kind: output, shape index: {}]  }
   0x1 LB: > { %s2166_s25 = sadd.s32 4294967295, %s2522_s24   ;;  %p2170_p0 = scmp.ge.s32.totalorder %s2522_s24, 1  ;;  %s2522_s24 = sphi %s2565_s24, %s17_s24  }
   0x2   : > { %p237_p1 = scmp.lt.s32.totalorder %s2522_s24, 3 }
   0x4   : > { %p238_p2 = pnand %p2170_p0, %p237_p1 }
   0x5   : > { %v365_v0 = vld [vmem:[%s3701_s1] sm:$0xff] (!%p238_p2)  ;;  %p2578_p3 = scmp.lt.s32.totalorder (!%p238_p2), %s2166_s25, 1  ;;  %v2524_v1 = vmov (!%p238_p2), 0.0   ;;  %vm373_vm0 = vcmask (!%p238_p2), 64512   ;;  %v1800_v35 = vld [vmem:[%s3705_s5 + $0x8] sm:$0xff] (!%p238_p2)  ;;  %v1801_v37 = vld [vmem:[%s3705_s5 + $0x10] sm:$0xff] (!%p238_p2)  ;;  %v827_v58 = vlaneseq (!%p238_p2) }
   0x6   : > { %241 = sbr.rel (%p238_p2) target bundleno = 649 (0x289), region = 48  ;;  %2295 = vmatprep.subr.mxu0 (!%p238_p2), %v365_v0  ;;  %283 = vst [vmem:[#allocation2 + $0x20] sm:$0xff] (!%p238_p2), %v2524_v1  ;;  %284 = vst [vmem:[#allocation2 + $0x28] sm:$0x3] (!%p238_p2), %v2524_v1  ;;  %v1799_v34 = vld [vmem:[%s3705_s5] sm:$0xff] (!%p238_p2)  ;;  %v1802_v38 = vld [vmem:[%s3705_s5 + $0x18] sm:$0xff] (!%p238_p2) }
   0x7   : > { %279 = vst [vmem:[#allocation2] sm:$0xff] (!%p238_p2), %v2524_v1  ;;  %280 = vst [vmem:[#allocation2 + $0x8] sm:$0xff] (!%p238_p2), %v2524_v1  ;;  %2296 = vmatpush3.msra.mxu0 (!%p238_p2), %v365_v0  ;;  %v2425_v36 = vpack.c.bf16 (!%p238_p2), %v1800_v35, %v1799_v34  ;;  %v2429_v39 = vpack.c.bf16 (!%p238_p2), %v1802_v38, %v1801_v37  ;;  %v1803_v40 = vld [vmem:[%s3705_s5 + $0x20] sm:$0xff] (!%p238_p2)  ;;  %v1804_v41 = vld [vmem:[%s3705_s5 + $0x28] sm:$0xff] (!%p238_p2)  ;;  %v828_v59 = vshrl.u32 (!%p238_p2), %v827_v58, 7 }
   0x8   : > { %281 = vst [vmem:[#allocation2 + $0x10] sm:$0x3] (!%p238_p2), %v2524_v1  ;;  %282 = vst [vmem:[#allocation2 + $0x18] sm:$0xff] (!%p238_p2), %v2524_v1  ;;  %v2433_v42 = vpack.c.bf16 (!%p238_p2), %v1804_v41, %v1803_v40  ;;  %v1805_v43 = vld [vmem:[%s3705_s5 + $0x30] sm:$0xff] (!%p238_p2)  ;;  %v1806_v44 = vld [vmem:[%s3705_s5 + $0x38] sm:$0xff] (!%p238_p2) }
   0x9   : > { %285 = vst [vmem:[#allocation2 + $0x30] sm:$0xff] (!%p238_p2), %v2524_v1  ;;  %286 = vst [vmem:[#allocation2 + $0x38] sm:$0xff] (!%p238_p2), %v2524_v1  ;;  %2426 = vmatprep.subr.bf16.mxu0 (!%p238_p2), %v2425_v36  ;;  %2457 = vmatprep.subr.bf16.mxu1 (!%p238_p2), %v2425_v36  ;;  %v2437_v45 = vpack.c.bf16 (!%p238_p2), %v1806_v44, %v1805_v43  ;;  %v1807_v46 = vld [vmem:[%s3705_s5 + $0x40] sm:$0xff] (!%p238_p2)  ;;  %v1808_v47 = vld [vmem:[%s3705_s5 + $0x48] sm:$0xff] (!%p238_p2)  ;;  %v829_v60 = vsub.s32 (!%p238_p2), 0, %v828_v59  ;;  %v929_v61 = vsub.s32 (!%p238_p2), 1, %v828_v59 }
   0xa   : > { %287 = vst [vmem:[#allocation2 + $0x40] sm:$0x3] (!%p238_p2), %v2524_v1  ;;  %288 = vst [vmem:[#allocation2 + $0x48] sm:$0xff] (!%p238_p2), %v2524_v1  ;;  %2465 = vmatpush3.bf16.msra.mxu1 (!%p238_p2), %v2425_v36  ;;  %v2441_v48 = vpack.c.bf16 (!%p238_p2), %v1808_v47, %v1807_v46  ;;  %v1809_v49 = vld [vmem:[%s3705_s5 + $0x50] sm:$0xff] (!%p238_p2)  ;;  %v1810_v50 = vld [vmem:[%s3705_s5 + $0x58] sm:$0xff] (!%p238_p2) }
   0xb   : > { %289 = vst [vmem:[#allocation2 + $0x50] sm:$0xff] (!%p238_p2), %v2524_v1  ;;  %290 = vst [vmem:[#allocation2 + $0x58] sm:$0x3] (!%p238_p2), %v2524_v1  ;;  %2458 = vmatprep.subr.bf16.mxu1 (!%p238_p2), %v2429_v39  ;;  %v2445_v51 = vpack.c.bf16 (!%p238_p2), %v1810_v50, %v1809_v49  ;;  %v1811_v52 = vld [vmem:[%s3705_s5 + $0x60] sm:$0xff] (!%p238_p2)  ;;  %v1812_v53 = vld [vmem:[%s3705_s5 + $0x68] sm:$0xff] (!%p238_p2) }
   0xc   : > { %291 = vst [vmem:[#allocation2 + $0x60] sm:$0xff] (!%p238_p2), %v2524_v1  ;;  %292 = vst [vmem:[#allocation2 + $0x68] sm:$0xff] (!%p238_p2), %v2524_v1  ;;  %v2449_v54 = vpack.c.bf16 (!%p238_p2), %v1812_v53, %v1811_v52  ;;  %v1813_v55 = vld [vmem:[%s3705_s5 + $0x70] sm:$0xff] (!%p238_p2)  ;;  %v1814_v56 = vld [vmem:[%s3705_s5 + $0x78] sm:$0xff] (!%p238_p2) }
   0xd   : > { %293 = vst [vmem:[#allocation2 + $0x70] sm:$0x3] %v2524_v1  ;;  %294 = vst [vmem:[#allocation2 + $0x78] sm:$0xff] %v2524_v1  ;;  %s3710_s25 = smov (!%p2578_p3, %s2166_s25), 1  ;;  %v2453_v57 = vpack.c.bf16 %v1814_v56, %v1813_v55  ;;  %v792_v62 = vld [vmem:[%s3703_s3] sm:$0x7] }
   0xe   : > { %295 = vst [vmem:[#allocation2 + $0x80] sm:$0xff] %v2524_v1  ;;  %296 = vst [vmem:[#allocation2 + $0x88] sm:$0x3] %v2524_v1  ;;  %s2212_s29 = sshll.u32 %s3710_s25, 8  ;;  %2466 = vmatpush3.bf16.msra.mxu1 %v2429_v39  ;;  %v2714_v63 = vld [vmem:[%s3702_s2] ss:$0 sm:$0xff]  ;;  %v2716_v0 = vrot.slane %v792_v62, %v829_v60 }
   0xf   : > { %297 = vst [vmem:[#allocation2 + $0x90] sm:$0xff] %v2524_v1  ;;  %298 = vst [vmem:[#allocation2 + $0x98] sm:$0xff] %v2524_v1  ;;  %s2594_s9 = scalar_lea.vmem %s3700_s0, %s2212_s29  ;;  %2459 = vmatprep.subr.bf16.mxu1 %v2433_v42  ;;  %s3568_s20 = scalar_lea.vmem %s3707_s7, %s2212_s29 }
  0x10   : > { %299 = vst [vmem:[#allocation2 + $0xa0] sm:$0x3] %v2524_v1  ;;  %300 = vst [vmem:[#allocation2 + $0xa8] sm:$0xff] %v2524_v1  ;;  %v333_v2 = vld [vmem:[%s2594_s9] sm:$0xff]  ;;  %v334_v3 = vld [vmem:[%s2594_s9 + $0x8] sm:$0xff] }
  0x11   : > { %301 = vst [vmem:[#allocation2 + $0xb0] sm:$0xff] %v2524_v1  ;;  %302 = vst [vmem:[#allocation2 + $0xb8] sm:$0x3] %v2524_v1  ;;  %v335_v4 = vld [vmem:[%s2594_s9 + $0x10] sm:$0xff]  ;;  %2297 = vmatprep.mubr.msk.f32.mxu0 %vm373_vm0, %v333_v2  ;;  %v336_v5 = vld [vmem:[%s2594_s9 + $0x18] sm:$0xff] }
  0x12   : > { %303 = vst [vmem:[#allocation2 + $0xc0] sm:$0xff] %v2524_v1  ;;  %304 = vst [vmem:[#allocation2 + $0xc8] sm:$0xff] %v2524_v1  ;;  %2298 = vmatmul.mubr.msk.f32.vlgmr.msra.gmra.mrb[0].mxu0 %vm373_vm0, %v334_v3  ;;  %v337_v6 = vld [vmem:[%s2594_s9 + $0x20] sm:$0xff]  ;;  %v338_v7 = vld [vmem:[%s2594_s9 + $0x28] sm:$0xff]  ;;  %2467 = vmatpush3.bf16.msra.mxu1 %v2433_v42 }
  0x13   : > { %305 = vst [vmem:[#allocation2 + $0xd0] sm:$0x3] %v2524_v1  ;;  %306 = vst [vmem:[#allocation2 + $0xd8] sm:$0xff] %v2524_v1  ;;  %2300 = vmatprep.mubr.msk.f32.mxu0 %vm373_vm0, %v335_v4  ;;  %v339_v8 = vld [vmem:[%s2594_s9 + $0x30] sm:$0xff]  ;;  %v340_v9 = vld [vmem:[%s2594_s9 + $0x38] sm:$0xff]  ;;  %2428 = vmatpush3.bf16.msra.mxu0 %v2425_v36  ;;  %v2718_v4 = vrot.slane %v792_v62, %v929_v61 }
  0x14   : > { %307 = vst [vmem:[#allocation2 + $0xe0] sm:$0xff] %v2524_v1  ;;  %308 = vst [vmem:[#allocation2 + $0xe8] sm:$0x3] %v2524_v1  ;;  %v341_v10 = vld [vmem:[%s2594_s9 + $0x40] sm:$0xff]  ;;  %v342_v11 = vld [vmem:[%s2594_s9 + $0x48] sm:$0xff]  ;;  %2430 = vmatprep.subr.bf16.mxu0 %v2429_v39  ;;  %2460 = vmatprep.subr.bf16.mxu1 %v2437_v45 }
  0x15   : > { %309 = vst [vmem:[#allocation2 + $0xf0] sm:$0xff] %v2524_v1  ;;  %310 = vst [vmem:[#allocation2 + $0xf8] sm:$0xff] %v2524_v1  ;;  %v343_v12 = vld [vmem:[%s2594_s9 + $0x50] sm:$0xff]  ;;  %v344_v13 = vld [vmem:[%s2594_s9 + $0x58] sm:$0xff] }
  0x16   : > { %311 = vst [vmem:[#allocation2 + $0x100] sm:$0x3] %v2524_v1  ;;  %312 = vst [vmem:[#allocation2 + $0x108] sm:$0xff] %v2524_v1  ;;  %2301 = vmatmul.mubr.msk.f32.gmra.mrb[2].mxu0 %vm373_vm0, %v336_v5  ;;  %v345_v14 = vld [vmem:[%s2594_s9 + $0x60] sm:$0xff]  ;;  %v346_v15 = vld [vmem:[%s2594_s9 + $0x68] sm:$0xff]  ;;  %2468 = vmatpush3.bf16.msra.mxu1 %v2437_v45 }
  0x17   : > { %313 = vst [vmem:[#allocation2 + $0x110] sm:$0xff] %v2524_v1  ;;  %314 = vst [vmem:[#allocation2 + $0x118] sm:$0x3] %v2524_v1  ;;  %2303 = vmatprep.mubr.msk.f32.mxu0 %vm373_vm0, %v337_v6  ;;  %v347_v16 = vld [vmem:[%s2594_s9 + $0x70] sm:$0xff]  ;;  %v348_v17 = vld [vmem:[%s2594_s9 + $0x78] sm:$0xff]  ;;  %2432 = vmatpush3.bf16.msra.mxu0 %v2429_v39 }
  0x18   : > { %315 = vst [vmem:[#allocation2 + $0x120] sm:$0xff] %v2524_v1  ;;  %316 = vst [vmem:[#allocation2 + $0x128] sm:$0xff] %v2524_v1  ;;  %v349_v18 = vld [vmem:[%s2594_s9 + $0x80] sm:$0xff]  ;;  %v350_v19 = vld [vmem:[%s2594_s9 + $0x88] sm:$0xff]  ;;  %2434 = vmatprep.subr.bf16.mxu0 %v2433_v42  ;;  %2461 = vmatprep.subr.bf16.mxu1 %v2441_v48 }
  0x19   : > { %317 = vst [vmem:[#allocation2 + $0x130] sm:$0x3] %v2524_v1  ;;  %318 = vst [vmem:[#allocation2 + $0x138] sm:$0xff] %v2524_v1  ;;  %v351_v20 = vld [vmem:[%s2594_s9 + $0x90] sm:$0xff]  ;;  %v352_v21 = vld [vmem:[%s2594_s9 + $0x98] sm:$0xff] }
  0x1a   : > { %319 = vst [vmem:[#allocation2 + $0x140] sm:$0xff] %v2524_v1  ;;  %320 = vst [vmem:[#allocation2 + $0x148] sm:$0x3] %v2524_v1  ;;  %2304 = vmatmul.mubr.msk.f32.gmra.mrb[4].mxu0 %vm373_vm0, %v338_v7  ;;  %v353_v22 = vld [vmem:[%s2594_s9 + $0xa0] sm:$0xff]  ;;  %v354_v23 = vld [vmem:[%s2594_s9 + $0xa8] sm:$0xff]  ;;  %2469 = vmatpush3.bf16.msra.mxu1 %v2441_v48 }
  0x1b   : > { %321 = vst [vmem:[#allocation2 + $0x150] sm:$0xff] %v2524_v1  ;;  %322 = vst [vmem:[#allocation2 + $0x158] sm:$0xff] %v2524_v1  ;;  %2306 = vmatprep.mubr.msk.f32.mxu0 %vm373_vm0, %v339_v8  ;;  %v355_v24 = vld [vmem:[%s2594_s9 + $0xb0] sm:$0xff]  ;;  %v356_v25 = vld [vmem:[%s2594_s9 + $0xb8] sm:$0xff]  ;;  %2436 = vmatpush3.bf16.msra.mxu0 %v2433_v42 }
  0x1c   : > { %323 = vst [vmem:[#allocation2 + $0x160] sm:$0x3] %v2524_v1  ;;  %324 = vst [vmem:[#allocation2 + $0x168] sm:$0xff] %v2524_v1  ;;  %v357_v26 = vld [vmem:[%s2594_s9 + $0xc0] sm:$0xff]  ;;  %v358_v27 = vld [vmem:[%s2594_s9 + $0xc8] sm:$0xff]  ;;  %2438 = vmatprep.subr.bf16.mxu0 %v2437_v45  ;;  %2462 = vmatprep.subr.bf16.mxu1 %v2445_v51 }
  0x1d   : > { %325 = vst [vmem:[#allocation2 + $0x170] sm:$0xff] %v2524_v1  ;;  %326 = vst [vmem:[#allocation2 + $0x178] sm:$0x3] %v2524_v1  ;;  %v359_v28 = vld [vmem:[%s2594_s9 + $0xd0] sm:$0xff]  ;;  %v360_v29 = vld [vmem:[%s2594_s9 + $0xd8] sm:$0xff] }
  0x1e   : > { %327 = vst [vmem:[#allocation2 + $0x180] sm:$0xff] %v2524_v1  ;;  %328 = vst [vmem:[#allocation2 + $0x188] sm:$0xff] %v2524_v1  ;;  %2307 = vmatmul.mubr.msk.f32.gmra.mrb[6].mxu0 %vm373_vm0, %v340_v9  ;;  %v361_v30 = vld [vmem:[%s2594_s9 + $0xe0] sm:$0xff]  ;;  %v362_v31 = vld [vmem:[%s2594_s9 + $0xe8] sm:$0xff]  ;;  %2470 = vmatpush3.bf16.msra.mxu1 %v2445_v51  ;;  %v831_v9 = vmul.f32 0.0, %v2716_v0 }
  0x1f   : > { %329 = vst [vmem:[#allocation2 + $0x190] sm:$0x3] %v2524_v1  ;;  %330 = vst [vmem:[#allocation2 + $0x198] sm:$0xff] %v2524_v1  ;;  %2309 = vmatprep.mubr.msk.f32.mxu0 %vm373_vm0, %v341_v10  ;;  %v363_v32 = vld [vmem:[%s2594_s9 + $0xf0] sm:$0xff]  ;;  %v364_v33 = vld [vmem:[%s2594_s9 + $0xf8] sm:$0xff]  ;;  %2440 = vmatpush3.bf16.msra.mxu0 %v2437_v45 }
  0x20   : > { %331 = vst [vmem:[#allocation2 + $0x1a0] sm:$0xff] %v2524_v1  ;;  %332 = vst [vmem:[#allocation2 + $0x1a8] sm:$0x3] %v2524_v1  ;;  %2442 = vmatprep.subr.bf16.mxu0 %v2441_v48  ;;  %2463 = vmatprep.subr.bf16.mxu1 %v2449_v54  ;;  %v1029_v1 = vsub.s32 2, %v828_v59  ;;  %v895_v2 = vld [vmem:[#allocation2 + $0x1] sm:$0xff]  ;;  %v896_v5 = vld [vmem:[#allocation2 + $0x9] sm:$0xff] }
  0x21   : > { %v931_v10 = vmul.f32 %v2718_v4, %v895_v2 }
  0x22   : > { %2310 = vmatmul.mubr.msk.f32.gmra.mrb[8].mxu0 %vm373_vm0, %v342_v11  ;;  %2471 = vmatpush3.bf16.msra.mxu1 %v2449_v54  ;;  %v2724_v11 = vrot.slane %v792_v62, %v1029_v1 }
  0x23   : > { %2312 = vmatprep.mubr.msk.f32.mxu0 %vm373_vm0, %v343_v12  ;;  %2444 = vmatpush3.bf16.msra.mxu0 %v2441_v48 }
  0x24   : > { %2446 = vmatprep.subr.bf16.mxu0 %v2445_v51  ;;  %2464 = vmatprep.subr.bf16.mxu1 %v2453_v57 }
  0x26   : > { %2313 = vmatmul.mubr.msk.f32.gmra.mrb[10].mxu0 %vm373_vm0, %v344_v13  ;;  %2472 = vmatpush3.bf16.msra.mxu1 %v2453_v57  ;;  %v995_v13 = vld [vmem:[#allocation2 + $0x2] sm:$0xff] }
  0x27   : > { %2315 = vmatprep.mubr.msk.f32.mxu0 %vm373_vm0, %v345_v14  ;;  %2448 = vmatpush3.bf16.msra.mxu0 %v2445_v51  ;;  %v932_v14 = vmul.f32 %v2718_v4, %v896_v5 }
  0x28   : > { %2450 = vmatprep.subr.bf16.mxu0 %v2449_v54 }
  0x2a   : > { %2316 = vmatmul.mubr.msk.f32.gmra.mrb[12].mxu0 %vm373_vm0, %v346_v15 }
  0x2b   : > { %2318 = vmatprep.mubr.msk.f32.mxu0 %vm373_vm0, %v347_v16  ;;  %2452 = vmatpush3.bf16.msra.mxu0 %v2449_v54 }
  0x2c   : > { %2454 = vmatprep.subr.bf16.mxu0 %v2453_v57 }
  0x2e   : > { %2319 = vmatmul.mubr.msk.f32.gmra.mrb[14].mxu0 %vm373_vm0, %v348_v17  ;;  %v996_v17 = vld [vmem:[#allocation2 + $0xa] sm:$0xff] }
  0x2f   : > { %2321 = vmatprep.mubr.msk.f32.mxu0 %vm373_vm0, %v349_v18  ;;  %2456 = vmatpush3.bf16.msra.mxu0 %v2453_v57 }
  0x32   : > { %2322 = vmatmul.mubr.msk.f32.gmra.mrb[16].mxu0 %vm373_vm0, %v350_v19 }
  0x33   : > { %2324 = vmatprep.mubr.msk.f32.mxu0 %vm373_vm0, %v351_v20 }
  0x36   : > { %2325 = vmatmul.mubr.msk.f32.gmra.mrb[18].mxu0 %vm373_vm0, %v352_v21  ;;  %v793_v21 = vld [vmem:[%s3703_s3 + $0x4] sm:$0x7] }
  0x37   : > { %2327 = vmatprep.mubr.msk.f32.mxu0 %vm373_vm0, %v353_v22  ;;  %v2742_v36 = vrot.slane %v793_v21, %v1029_v1  ;;  %v2747_v41 = vrot.slane %v793_v21, %v829_v60 }
  0x3a   : > { %2328 = vmatmul.mubr.msk.f32.gmra.mrb[20].mxu0 %vm373_vm0, %v354_v23 }
  0x3b   : > { %2330 = vmatprep.mubr.msk.f32.mxu0 %vm373_vm0, %v355_v24  ;;  %v794_v24 = vld [vmem:[%s3703_s3 + $0x8] sm:$0x7] }
  0x3c   : > { %v2744_v37 = vrot.slane %v794_v24, %v929_v61  ;;  %v2750_v43 = vrot.slane %v794_v24, %v829_v60  ;;  %v2752_v44 = vrot.slane %v794_v24, %v1029_v1 }
  0x3e   : > { %2331 = vmatmul.mubr.msk.f32.gmra.mrb[22].mxu0 %vm373_vm0, %v356_v25  ;;  %v963_v25 = vadd.f32 %v931_v10, %v831_v9 }
  0x3f   : > { %2333 = vmatprep.mubr.msk.f32.mxu0 %vm373_vm0, %v357_v26  ;;  %v1031_v26 = vmul.f32 %v2724_v11, %v995_v13 }
  0x41   : > { %v1063_v40 = vadd.f32 %v1031_v26, %v963_v25 }
  0x42   : > { %2334 = vmatmul.mubr.msk.f32.gmra.mrb[24].mxu0 %vm373_vm0, %v358_v27 }
  0x43   : > { %2336 = vmatprep.mubr.msk.f32.mxu0 %vm373_vm0, %v359_v28  ;;  %v964_v28 = vadd.f32 %v932_v14, %v831_v9 }
  0x46   : > { %2337 = vmatmul.mubr.msk.f32.gmra.mrb[26].mxu0 %vm373_vm0, %v360_v29  ;;  %v1032_v29 = vmul.f32 %v2724_v11, %v996_v17 }
  0x47   : > { %2339 = vmatprep.mubr.msk.f32.mxu0 %vm373_vm0, %v361_v30 }
  0x48   : > { %v1064_v45 = vadd.f32 %v1032_v29, %v964_v28 }
  0x4a   : > { %2340 = vmatmul.mubr.msk.f32.gmra.mrb[28].mxu0 %vm373_vm0, %v362_v31 }
  0x4b   : > { %2342 = vmatprep.mubr.msk.f32.mxu0 %vm373_vm0, %v363_v32  ;;  %v2737_v32 = vrot.slane %v793_v21, %v929_v61 }
  0x4e   : > { %2343 = vmatmul.mubr.msk.f32.gmra.mrb[30].mxu0 %vm373_vm0, %v364_v33 }
  0xe5   : > { %v2299_v3 = vpop.f32.mrb[0].mxu0 }
  0xe6   : > { %v542_v6 = vadd.f32 %v2299_v3, %v2714_v63  ;;  %v536_v7 = vpop.f32.mrb[1].mxu0 }
  0xe7   : > { %v537_v8 = vadd.f32 %v2714_v63, %v536_v7 }
  0xe8   : > { %v696_v12 = vmax.f32 %v542_v6, 0.0 }
  0xe9   : > { %v695_v15 = vmax.f32 %v537_v8, 0.0  ;;  %v2302_v16 = vpop.f32.mrb[2].mxu0 }
  0xea   : > { %v728_v18 = vmin.f32 %v696_v12, 6.0  ;;  %v552_v19 = vadd.f32 %v2302_v16, %v2714_v63  ;;  %v546_v20 = vpop.f32.mrb[3].mxu0 }
  0xeb   : > { %v727_v22 = vmin.f32 %v695_v15, 6.0  ;;  %v547_v23 = vadd.f32 %v2714_v63, %v546_v20 }
  0xec   : > { %761 = vst [vmem:[#allocation2 + $0x21] sm:$0xff] %v728_v18  ;;  %v698_v27 = vmax.f32 %v552_v19, 0.0  ;;  %v1232_v49 = vmul.f32 %v2737_v32, %v728_v18  ;;  %v2757_v50 = vmul.f32 %v2718_v4, %v728_v18 }
  0xed   : > { %760 = vst [vmem:[#allocation2 + $0x19] sm:$0xff] %v727_v22  ;;  %v697_v30 = vmax.f32 %v547_v23, 0.0  ;;  %v2305_v31 = vpop.f32.mrb[4].mxu0  ;;  %v1231_v48 = vmul.f32 %v2737_v32, %v727_v22  ;;  %v933_v55 = vmul.f32 %v2718_v4, %v727_v22 }
  0xee   : > { %v2739_v33 = vmin.f32 %v698_v27, 6.0  ;;  %v562_v34 = vadd.f32 %v2305_v31, %v2714_v63  ;;  %v556_v35 = vpop.f32.mrb[5].mxu0 }
  0xef   : > { %v729_v38 = vmin.f32 %v697_v30, 6.0  ;;  %v557_v39 = vadd.f32 %v2714_v63, %v556_v35 }
  0xf0   : > { %763 = vst [vmem:[#allocation2 + $0x39] sm:$0xff] %v2739_v33  ;;  %v700_v42 = vmax.f32 %v562_v34, 0.0  ;;  %v2764_v54 = vmul.f32 %v2744_v37, %v2739_v33  ;;  %v2775_v60 = vmul.f32 %v2737_v32, %v2739_v33 }
  0xf1   : > { %762 = vst [vmem:[#allocation2 + $0x31] sm:$0xff] %v729_v38  ;;  %v699_v46 = vmax.f32 %v557_v39, 0.0  ;;  %v2308_v47 = vpop.f32.mrb[6].mxu0  ;;  %v2771_v58 = vmul.f32 %v2744_v37, %v729_v38  ;;  %v2782_v5 = vmul.f32 %v2737_v32, %v729_v38  ;;  %v2785_v6 = vmul.f32 %v2718_v4, %v729_v38 }
  0xf2   : > { %v2759_v51 = vmin.f32 %v700_v42, 6.0  ;;  %v572_v52 = vadd.f32 %v2308_v47, %v2714_v63  ;;  %v566_v53 = vpop.f32.mrb[7].mxu0 }
  0xf3   : > { %v2767_v56 = vmin.f32 %v699_v46, 6.0  ;;  %v567_v57 = vadd.f32 %v2714_v63, %v566_v53  ;;  %v1296_v59 = vld [vmem:[#allocation2 + $0x22] sm:$0xff] }
  0xf4   : > { %765 = vst [vmem:[#allocation2 + $0x51] sm:$0xff] %v2759_v51  ;;  %v702_v61 = vmax.f32 %v572_v52, 0.0  ;;  %v1095_v62 = vld [vmem:[#allocation2 + $0x18] sm:$0xff]  ;;  %v2778_v2 = vld [vmem:[#allocation2 + $0x20] sm:$0xff]  ;;  %v1332_v3 = vmul.f32 %v2742_v36, %v1296_v59  ;;  %v2792_v12 = vmul.f32 %v1296_v59, %v2724_v11 }
  0xf5   : > { %v1295_v1 = vld [vmem:[#allocation2 + $0x1a] sm:$0xff]  ;;  %764 = vst [vmem:[#allocation2 + $0x49] sm:$0xff] %v2767_v56  ;;  %v701_v7 = vmax.f32 %v567_v57, 0.0  ;;  %v2311_v8 = vpop.f32.mrb[8].mxu0  ;;  %v1131_v9 = vmul.f32 %v2747_v41, %v1095_v62  ;;  %v1132_v10 = vmul.f32 %v2747_v41, %v2778_v2  ;;  %v833_v17 = vmul.f32 %v1095_v62, %v2716_v0 }
  0xf6   : > { %v2794_v13 = vmin.f32 %v702_v61, 6.0  ;;  %v582_v14 = vadd.f32 %v2311_v8, %v2714_v63  ;;  %v576_v15 = vpop.f32.mrb[9].mxu0  ;;  %v1331_v16 = vmul.f32 %v2742_v36, %v1295_v1  ;;  %v1033_v28 = vmul.f32 %v1295_v1, %v2724_v11 }
  0xf7   : > { %v2799_v18 = vmin.f32 %v701_v7, 6.0  ;;  %v577_v19 = vadd.f32 %v2714_v63, %v576_v15  ;;  %v1163_v20 = vadd.f32 %v1131_v9, %v1063_v40  ;;  %v1164_v21 = vadd.f32 %v1132_v10, %v1064_v45  ;;  %v2802_v22 = vld [vmem:[#allocation2 + $0x3a] sm:$0xff] }
  0xf8   : > { %767 = vst [vmem:[#allocation2 + $0x69] sm:$0xff] %v2794_v13  ;;  %v704_v23 = vmax.f32 %v582_v14, 0.0  ;;  %v2805_v24 = vld [vmem:[#allocation2 + $0x30] sm:$0xff]  ;;  %v1633_v26 = vmul.f32 %v2752_v44, %v2802_v22  ;;  %v965_v27 = vadd.f32 %v933_v55, %v833_v17  ;;  %v2815_v35 = vld [vmem:[#allocation2 + $0x38] sm:$0xff]  ;;  %v2819_v38 = vmul.f32 %v2744_v37, %v2767_v56 }
  0xf9   : > { %v2807_v25 = vld [vmem:[#allocation2 + $0x32] sm:$0xff]  ;;  %766 = vst [vmem:[#allocation2 + $0x61] sm:$0xff] %v2799_v18  ;;  %v703_v29 = vmax.f32 %v577_v19, 0.0  ;;  %v2314_v30 = vpop.f32.mrb[10].mxu0  ;;  %v1263_v31 = vadd.f32 %v1231_v48, %v1163_v20  ;;  %v1432_v34 = vmul.f32 %v2750_v43, %v2805_v24  ;;  %v1264_v46 = vadd.f32 %v1232_v49, %v1164_v21 }
  0xfa   : > { %v2821_v39 = vmin.f32 %v704_v23, 6.0  ;;  %v592_v40 = vadd.f32 %v2314_v30, %v2714_v63  ;;  %v586_v42 = vpop.f32.mrb[11].mxu0  ;;  %v1632_v45 = vmul.f32 %v2752_v44, %v2807_v25  ;;  %v1065_v53 = vadd.f32 %v1033_v28, %v965_v27  ;;  %v2856_v28 = vld [vmem:[%s3704_s4] ss:$0 sm:$0xff] }
  0xfb   : > { %v2826_v47 = vmin.f32 %v703_v29, 6.0  ;;  %v587_v48 = vadd.f32 %v2714_v63, %v586_v42  ;;  %v1363_v52 = vadd.f32 %v1331_v16, %v1263_v31  ;;  %v1364_v57 = vadd.f32 %v1332_v3, %v1264_v46 }
  0xfc   : > { %769 = vst [vmem:[#allocation2 + $0x81] sm:$0xff] %v2821_v39  ;;  %v706_v55 = vmax.f32 %v592_v40, 0.0  ;;  %v1433_v59 = vmul.f32 %v2750_v43, %v2815_v35  ;;  %v1133_v61 = vmul.f32 %v2805_v24, %v2747_v41  ;;  %v2834_v62 = vld [vmem:[#allocation2 + $0x48] sm:$0xff]  ;;  %v1333_v8 = vmul.f32 %v2807_v25, %v2742_v36 }
  0xfd   : > { %768 = vst [vmem:[#allocation2 + $0x79] sm:$0xff] %v2826_v47  ;;  %v705_v49 = vmax.f32 %v587_v48, 0.0  ;;  %v2317_v1 = vpop.f32.mrb[12].mxu0  ;;  %v1464_v7 = vadd.f32 %v1432_v34, %v1363_v52  ;;  %v1434_v9 = vmul.f32 %v2750_v43, %v2834_v62  ;;  %v2841_v3 = vld [vmem:[#allocation2 + $0x4a] sm:$0xff]  ;;  %v834_v23 = vmul.f32 %v2778_v2, %v2716_v0 }
  0xfe   : > { %v2843_v10 = vmin.f32 %v706_v55, 6.0  ;;  %v602_v14 = vadd.f32 %v2317_v1, %v2714_v63  ;;  %v596_v15 = vpop.f32.mrb[13].mxu0  ;;  %v1465_v16 = vadd.f32 %v1433_v59, %v1364_v57  ;;  %v1165_v17 = vadd.f32 %v1133_v61, %v1065_v53  ;;  %v2869_v53 = vld [vmem:[#allocation2 + $0x50] sm:$0xff] }
  0xff   : > { %v2846_v19 = vmin.f32 %v705_v49, 6.0  ;;  %v597_v20 = vadd.f32 %v2714_v63, %v596_v15  ;;  %v1564_v21 = vadd.f32 %v2771_v58, %v1464_v7  ;;  %v1634_v31 = vmul.f32 %v2752_v44, %v2841_v3 }
 0x100   : > { %771 = vst [vmem:[#allocation2 + $0x99] sm:$0xff] %v2843_v10  ;;  %v708_v27 = vmax.f32 %v602_v14, 0.0  ;;  %v1565_v29 = vadd.f32 %v2764_v54, %v1465_v16  ;;  %v1265_v30 = vadd.f32 %v2782_v5, %v1165_v17  ;;  %v966_v40 = vadd.f32 %v2757_v50, %v834_v23 }
 0x101   : > { %770 = vst [vmem:[#allocation2 + $0x91] sm:$0xff] %v2846_v19  ;;  %v707_v58 = vmax.f32 %v597_v20, 0.0  ;;  %v2320_v34 = vpop.f32.mrb[14].mxu0  ;;  %v1664_v2 = vadd.f32 %v1632_v45, %v1564_v21  ;;  %v1134_v42 = vmul.f32 %v2815_v35, %v2747_v41  ;;  %v1435_v15 = vmul.f32 %v2750_v43, %v2869_v53 }
 0x102   : > { %v2866_v46 = vmin.f32 %v708_v27, 6.0  ;;  %v612_v48 = vadd.f32 %v2320_v34, %v2714_v63  ;;  %v606_v54 = vpop.f32.mrb[15].mxu0  ;;  %v1665_v52 = vadd.f32 %v1633_v26, %v1565_v29  ;;  %v1365_v5 = vadd.f32 %v1333_v8, %v1265_v30 }
 0x103   : > { %v2871_v55 = vmin.f32 %v707_v58, 6.0  ;;  %v607_v57 = vadd.f32 %v2714_v63, %v606_v54  ;;  %v1703_v45 = vadd.f32 %v2856_v28, %v1664_v2  ;;  %v1066_v50 = vadd.f32 %v2792_v12, %v966_v40 }
 0x104   : > { %773 = vst [vmem:[#allocation2 + $0xb1] sm:$0xff] %v2866_v46  ;;  %v710_v59 = vmax.f32 %v612_v48, 0.0  ;;  %v1704_v61 = vadd.f32 %v2856_v28, %v1665_v52  ;;  %v1466_v49 = vadd.f32 %v1434_v9, %v1365_v5  ;;  %v1334_v26 = vmul.f32 %v2802_v22, %v2742_v36 }
 0x105   : > { %772 = vst [vmem:[#allocation2 + $0xa9] sm:$0xff] %v2871_v55  ;;  %v709_v1 = vmax.f32 %v607_v57, 0.0  ;;  %v2323_v7 = vpop.f32.mrb[16].mxu0  ;;  %v1735_v8 = vmax.f32 %v1703_v45, 0.0  ;;  %v1166_v14 = vadd.f32 %v1134_v42, %v1066_v50  ;;  %v835_v2 = vmul.f32 %v2805_v24, %v2716_v0  ;;  %v2898_v24 = vld [vmem:[#allocation2 + $0x52] sm:$0xff] }
 0x106   : > { %v742_v16 = vmin.f32 %v710_v59, 6.0  ;;  %v622_v12 = vadd.f32 %v2323_v7, %v2714_v63  ;;  %v616_v17 = vpop.f32.mrb[17].mxu0  ;;  %v1736_v20 = vmax.f32 %v1704_v61, 0.0  ;;  %v1566_v21 = vadd.f32 %v2819_v38, %v1466_v49 }
 0x107   : > { %v2885_v9 = vmin.f32 %v709_v1, 6.0  ;;  %v617_v23 = vadd.f32 %v2714_v63, %v616_v17  ;;  %v1767_v27 = vmin.f32 %v1735_v8, 6.0  ;;  %v1266_v29 = vadd.f32 %v2775_v60, %v1166_v14 }
 0x108   : > { %775 = vst [vmem:[#allocation2 + $0xc9] sm:$0xff] %v742_v16  ;;  %v712_v30 = vmax.f32 %v622_v12, 0.0  ;;  %v1768_v58 = vmin.f32 %v1736_v20, 6.0  ;;  %v1666_v34 = vadd.f32 %v1634_v31, %v1566_v21  ;;  %v1035_v48 = vmul.f32 %v2807_v25, %v2724_v11  ;;  %v2910_v16 = vld [vmem:[#allocation2 + $0x60] sm:$0xff] }
 0x109   : > { %774 = vst [vmem:[#allocation2 + $0xc1] sm:$0xff] %v2885_v9  ;;  %v711_v40 = vmax.f32 %v617_v23, 0.0  ;;  %v2326_v42 = vpop.f32.mrb[18].mxu0  ;;  %2377 = vmatprep.mubr.f32.mxu0 %v1767_v27  ;;  %v1366_v38 = vadd.f32 %v1334_v26, %v1266_v29  ;;  %v1135_v54 = vmul.f32 %v2834_v62, %v2747_v41  ;;  %v967_v57 = vadd.f32 %v2785_v6, %v835_v2 }
 0x10a   : > { %v744_v60 = vmin.f32 %v712_v30, 6.0  ;;  %v632_v52 = vadd.f32 %v2326_v42, %v2714_v63  ;;  %v626_v5 = vpop.f32.mrb[19].mxu0  ;;  %2378 = vmatmul.mubr.f32.vlgmr.msra.gmra.mrb[32].mxu0 %v1768_v58  ;;  %v1705_v31 = vadd.f32 %v2856_v28, %v1666_v34  ;;  %v1535_v25 = vmul.f32 %v2744_v37, %v2759_v51 }
 0x10b   : > { %v743_v45 = vmin.f32 %v711_v40, 6.0  ;;  %v627_v50 = vadd.f32 %v2714_v63, %v626_v5  ;;  %v1467_v59 = vadd.f32 %v1435_v15, %v1366_v38  ;;  %v1067_v26 = vadd.f32 %v1035_v48, %v967_v57  ;;  %v2926_v57 = vld [vmem:[#allocation2 + $0x62] sm:$0xff] }
 0x10c   : > { %777 = vst [vmem:[#allocation2 + $0xe1] sm:$0xff] %v744_v60  ;;  %v714_v61 = vmax.f32 %v632_v52, 0.0  ;;  %v1737_v49 = vmax.f32 %v1705_v31, 0.0  ;;  %v936_v1 = vmul.f32 %v2718_v4, %v2739_v33  ;;  %v1635_v6 = vmul.f32 %v2752_v44, %v2898_v24 }
 0x10d   : > { %776 = vst [vmem:[#allocation2 + $0xd9] sm:$0xff] %v743_v45  ;;  %v713_v7 = vmax.f32 %v627_v50, 0.0  ;;  %v2329_v8 = vpop.f32.mrb[20].mxu0  ;;  %v1567_v14 = vadd.f32 %v1535_v25, %v1467_v59  ;;  %v1235_v15 = vmul.f32 %v2737_v32, %v2767_v56  ;;  %v1167_v23 = vadd.f32 %v1135_v54, %v1067_v26 }
 0x10e   : > { %v746_v12 = vmin.f32 %v714_v61, 6.0  ;;  %v642_v17 = vadd.f32 %v2329_v8, %v2714_v63  ;;  %v1769_v20 = vmin.f32 %v1737_v49, 6.0  ;;  %v636_v21 = vpop.f32.mrb[21].mxu0  ;;  %v1335_v30 = vmul.f32 %v2841_v3, %v2742_v36 }
 0x10f   : > { %v745_v27 = vmin.f32 %v713_v7, 6.0  ;;  %v637_v33 = vadd.f32 %v2714_v63, %v636_v21  ;;  %v1667_v29 = vadd.f32 %v1635_v6, %v1567_v14  ;;  %v1267_v34 = vadd.f32 %v1235_v15, %v1167_v23 }
 0x110   : > { %779 = vst [vmem:[#allocation2 + $0xf9] sm:$0xff] %v746_v12  ;;  %v716_v58 = vmax.f32 %v642_v17, 0.0  ;;  %2380 = vmatprep.mubr.f32.mxu0 %v1769_v20  ;;  %v1436_v2 = vmul.f32 %v2750_v43, %v2910_v16  ;;  %v836_v40 = vmul.f32 %v2815_v35, %v2716_v0  ;;  %v1036_v54 = vmul.f32 %v2802_v22, %v2724_v11  ;;  %v2935_v20 = vld [vmem:[#allocation2 + $0x68] sm:$0xff] }
 0x111   : > { %778 = vst [vmem:[#allocation2 + $0xf1] sm:$0xff] %v745_v27  ;;  %v715_v42 = vmax.f32 %v637_v33, 0.0  ;;  %v1706_v38 = vadd.f32 %v2856_v28, %v1667_v29  ;;  %v2332_v48 = vpop.f32.mrb[22].mxu0  ;;  %v1136_v60 = vmul.f32 %v2869_v53, %v2747_v41  ;;  %v1367_v31 = vadd.f32 %v1335_v30, %v1267_v34 }
 0x112   : > { %v748_v52 = vmin.f32 %v716_v58, 6.0  ;;  %v652_v5 = vadd.f32 %v2332_v48, %v2714_v63  ;;  %v646_v45 = vpop.f32.mrb[23].mxu0  ;;  %v968_v50 = vadd.f32 %v936_v1, %v836_v40  ;;  %v1536_v22 = vmul.f32 %v2744_v37, %v2799_v18 }
 0x113   : > { %v747_v35 = vmin.f32 %v715_v42, 6.0  ;;  %v1738_v59 = vmax.f32 %v1706_v38, 0.0  ;;  %v647_v25 = vadd.f32 %v2714_v63, %v646_v45  ;;  %v1468_v49 = vadd.f32 %v1436_v2, %v1367_v31  ;;  %v2944_v2 = vld [vmem:[#allocation2 + $0x6a] sm:$0xff] }
 0x114   : > { %781 = vst [vmem:[#allocation2 + $0x111] sm:$0xff] %v748_v52  ;;  %v718_v61 = vmax.f32 %v652_v5, 0.0  ;;  %v1068_v26 = vadd.f32 %v1036_v54, %v968_v50  ;;  %v1636_v8 = vmul.f32 %v2752_v44, %v2926_v57  ;;  %v1236_v1 = vmul.f32 %v2737_v32, %v2759_v51 }
 0x115   : > { %780 = vst [vmem:[#allocation2 + $0x109] sm:$0xff] %v747_v35  ;;  %v1770_v7 = vmin.f32 %v1738_v59, 6.0  ;;  %v717_v14 = vmax.f32 %v647_v25, 0.0  ;;  %v2335_v6 = vpop.f32.mrb[24].mxu0  ;;  %v1568_v12 = vadd.f32 %v1536_v22, %v1468_v49  ;;  %v837_v33 = vmul.f32 %v2834_v62, %v2716_v0  ;;  %v2962_v49 = vld [vmem:[#allocation2 + $0x78] sm:$0xff] }
 0x116   : > { %v750_v15 = vmin.f32 %v718_v61, 6.0  ;;  %v1168_v17 = vadd.f32 %v1136_v60, %v1068_v26  ;;  %v662_v21 = vadd.f32 %v2335_v6, %v2714_v63  ;;  %v656_v23 = vpop.f32.mrb[25].mxu0  ;;  %v937_v29 = vmul.f32 %v2718_v4, %v2767_v56 }
 0x117   : > { %2381 = vmatmul.mubr.f32.gmra.mrb[34].mxu0 %v1770_v7  ;;  %v749_v27 = vmin.f32 %v717_v14, 6.0  ;;  %v1668_v30 = vadd.f32 %v1636_v8, %v1568_v12  ;;  %v1336_v34 = vmul.f32 %v2898_v24, %v2742_v36  ;;  %v1437_v42 = vmul.f32 %v2750_v43, %v2935_v20  ;;  %v2968_v8 = vld [vmem:[#allocation2 + $0x7a] sm:$0xff] }
 0x118   : > { %783 = vst [vmem:[#allocation2 + $0x129] sm:$0xff] %v750_v15  ;;  %v1268_v58 = vadd.f32 %v1236_v1, %v1168_v17  ;;  %v720_v40 = vmax.f32 %v662_v21, 0.0  ;;  %v969_v38 = vadd.f32 %v937_v29, %v837_v33  ;;  %v1037_v62 = vmul.f32 %v2841_v3, %v2724_v11 }
 0x119   : > { %782 = vst [vmem:[#allocation2 + $0x121] sm:$0xff] %v749_v27  ;;  %v1137_v56 = vmul.f32 %v2910_v16, %v2747_v41  ;;  %v2338_v48 = vpop.f32.mrb[26].mxu0  ;;  %v1707_v54 = vadd.f32 %v2856_v28, %v1668_v30  ;;  %v1537_v52 = vmul.f32 %v2744_v37, %v2794_v13  ;;  %v1637_v45 = vmul.f32 %v2752_v44, %v2944_v2 }
 0x11a   : > { %v1368_v60 = vadd.f32 %v1336_v34, %v1268_v58  ;;  %v752_v5 = vmin.f32 %v720_v40, 6.0  ;;  %v666_v31 = vpop.f32.mrb[27].mxu0  ;;  %v1069_v50 = vadd.f32 %v1037_v62, %v969_v38  ;;  %v657_v35 = vadd.f32 %v2714_v63, %v656_v23 }
 0x11b   : > { %v838_v3 = vmul.f32 %v2869_v53, %v2716_v0  ;;  %v1739_v59 = vmax.f32 %v1707_v54, 0.0  ;;  %v1237_v61 = vmul.f32 %v2737_v32, %v2799_v18  ;;  %v938_v22 = vmul.f32 %v2718_v4, %v2759_v51 }
 0x11c   : > { %v1469_v25 = vadd.f32 %v1437_v42, %v1368_v60  ;;  %785 = vst [vmem:[#allocation2 + $0x141] sm:$0xff] %v752_v5  ;;  %v1169_v26 = vadd.f32 %v1137_v56, %v1069_v50  ;;  %v1337_v7 = vmul.f32 %v2926_v57, %v2742_v36  ;;  %v719_v14 = vmax.f32 %v657_v35, 0.0  ;;  %v2990_v42 = vld [vmem:[#allocation2 + $0x80] sm:$0xff] }
 0x11d   : > { %v1038_v53 = vmul.f32 %v2898_v24, %v2724_v11  ;;  %v2972_v1 = vpop.f32.mrb[28].mxu0  ;;  %v1771_v6 = vmin.f32 %v1739_v59, 6.0  ;;  %v970_v12 = vadd.f32 %v938_v22, %v838_v3  ;;  %v1138_v17 = vmul.f32 %v2935_v20, %v2747_v41 }
 0x11e   : > { %v1569_v15 = vadd.f32 %v1537_v52, %v1469_v25  ;;  %v2976_v21 = vpop.f32.mrb[29].mxu0  ;;  %v1269_v51 = vadd.f32 %v1237_v61, %v1169_v26  ;;  %v1438_v23 = vmul.f32 %v2750_v43, %v2962_v49  ;;  %v1538_v27 = vmul.f32 %v2744_v37, %v2826_v47  ;;  %v3001_v52 = vld [vmem:[#allocation2 + $0x82] sm:$0xff] }
 0x11f   : > { %v2982_v33 = vmin.f32 %v719_v14, 6.0  ;;  %2383 = vmatprep.mubr.f32.mxu0 %v1771_v6  ;;  %v1638_v29 = vmul.f32 %v2752_v44, %v2968_v8  ;;  %v1070_v30 = vadd.f32 %v1038_v53, %v970_v12  ;;  %v672_v58 = vadd.f32 %v2338_v48, %v2714_v63 }
 0x120   : > { %v1669_v24 = vadd.f32 %v1637_v45, %v1569_v15  ;;  %v1369_v34 = vadd.f32 %v1337_v7, %v1269_v51  ;;  %v1238_v40 = vmul.f32 %v2737_v32, %v2794_v13  ;;  %v839_v38 = vmul.f32 %v2910_v16, %v2716_v0 }
 0x121   : > { %784 = vst [vmem:[#allocation2 + $0x139] sm:$0xff] %v2982_v33  ;;  %v939_v62 = vmul.f32 %v2718_v4, %v2799_v18  ;;  %v2996_v56 = vpop.f32.mrb[30].mxu0  ;;  %v1170_v60 = vadd.f32 %v1138_v17, %v1070_v30  ;;  %v1338_v48 = vmul.f32 %v2944_v2, %v2742_v36  ;;  %v722_v5 = vmax.f32 %v672_v58, 0.0 }
 0x122   : > { %v1708_v54 = vadd.f32 %v2856_v28, %v1669_v24  ;;  %v3003_v45 = vpop.f32.mrb[31].mxu0  ;;  %v1470_v50 = vadd.f32 %v1438_v23, %v1369_v34  ;;  %v1039_v16 = vmul.f32 %v2926_v57, %v2724_v11  ;;  %v1139_v18 = vmul.f32 %v2962_v49, %v2747_v41  ;;  %v3020_v23 = vld [vmem:[#allocation2 + $0x90] sm:$0xff] }
 0x123   : > { %v971_v35 = vadd.f32 %v939_v62, %v839_v38  ;;  %v1270_v59 = vadd.f32 %v1238_v40, %v1170_v60  ;;  %v1439_v25 = vmul.f32 %v2750_v43, %v2990_v42  ;;  %v754_v61 = vmin.f32 %v722_v5, 6.0 }
 0x124   : > { %v1740_v3 = vmax.f32 %v1708_v54, 0.0  ;;  %v1570_v22 = vadd.f32 %v1538_v27, %v1470_v50  ;;  %v1539_v26 = vmul.f32 %v2744_v37, %v2821_v39  ;;  %v1639_v7 = vmul.f32 %v2752_v44, %v3001_v52 }
 0x125   : > { %v1071_v14 = vadd.f32 %v1039_v16, %v971_v35  ;;  %v1370_v6 = vadd.f32 %v1338_v48, %v1270_v59  ;;  %787 = vst [vmem:[#allocation2 + $0x159] sm:$0xff] %v754_v61  ;;  %v667_v57 = vadd.f32 %v2714_v63, %v666_v31  ;;  %v840_v15 = vmul.f32 %v2935_v20, %v2716_v0  ;;  %v3039_v35 = vld [vmem:[#allocation2 + $0x92] sm:$0xff] }
 0x126   : > { %v1772_v53 = vmin.f32 %v1740_v3, 6.0  ;;  %v1670_v12 = vadd.f32 %v1638_v29, %v1570_v22  ;;  %v1239_v51 = vmul.f32 %v2737_v32, %v2826_v47  ;;  %v940_v27 = vmul.f32 %v2718_v4, %v2794_v13  ;;  %v3048_v22 = vld [vmem:[#allocation2 + $0x98] sm:$0xff] }
 0x127   : > { %v1171_v17 = vadd.f32 %v1139_v18, %v1071_v14  ;;  %v1471_v24 = vadd.f32 %v1439_v25, %v1370_v6  ;;  %v1339_v30 = vmul.f32 %v2968_v8, %v2742_v36  ;;  %v721_v58 = vmax.f32 %v667_v57, 0.0 }
 0x128   : > { %2384 = vmatmul.mubr.f32.gmra.mrb[36].mxu0 %v1772_v53  ;;  %v1040_v31 = vmul.f32 %v2944_v2, %v2724_v11  ;;  %v1709_v20 = vadd.f32 %v2856_v28, %v1670_v12  ;;  %v972_v34 = vadd.f32 %v940_v27, %v840_v15  ;;  %v1140_v40 = vmul.f32 %v2990_v42, %v2747_v41  ;;  %v3061_v12 = vld [vmem:[#allocation2 + $0x9a] sm:$0xff] }
 0x129   : > { %v1271_v29 = vadd.f32 %v1239_v51, %v1171_v17  ;;  %v1571_v38 = vadd.f32 %v1539_v26, %v1471_v24  ;;  %v1440_v13 = vmul.f32 %v2750_v43, %v3020_v23  ;;  %v1540_v62 = vmul.f32 %v2744_v37, %v2846_v19 }
 0x12a   : > { %v3035_v54 = vmin.f32 %v721_v58, 6.0  ;;  %v1741_v60 = vmax.f32 %v1709_v20, 0.0  ;;  %v1072_v5 = vadd.f32 %v1040_v31, %v972_v34  ;;  %v1240_v2 = vmul.f32 %v2737_v32, %v2821_v39 }
 0x12b   : > { %v1371_v48 = vadd.f32 %v1339_v30, %v1271_v29  ;;  %v1671_v50 = vadd.f32 %v1639_v7, %v1571_v38  ;;  %v682_v16 = vadd.f32 %v2972_v1, %v2714_v63  ;;  %v841_v18 = vmul.f32 %v2962_v49, %v2716_v0 }
 0x12c   : > { %786 = vst [vmem:[#allocation2 + $0x151] sm:$0xff] %v3035_v54  ;;  %v941_v3 = vmul.f32 %v2718_v4, %v2826_v47  ;;  %v1773_v59 = vmin.f32 %v1741_v60, 6.0  ;;  %v1172_v61 = vadd.f32 %v1140_v40, %v1072_v5  ;;  %v1041_v26 = vmul.f32 %v2968_v8, %v2724_v11 }
 0x12d   : > { %v1472_v25 = vadd.f32 %v1440_v13, %v1371_v48  ;;  %v1710_v7 = vadd.f32 %v2856_v28, %v1671_v50  ;;  %v724_v14 = vmax.f32 %v682_v16, 0.0  ;;  %v1141_v1 = vmul.f32 %v3020_v23, %v2747_v41 }
 0x12e   : > { %v973_v53 = vadd.f32 %v941_v3, %v841_v18  ;;  %2386 = vmatprep.mubr.f32.mxu1 %v1773_v59  ;;  %v1640_v47 = vmul.f32 %v2752_v44, %v3039_v35  ;;  %v1272_v6 = vadd.f32 %v1240_v2, %v1172_v61  ;;  %v1340_v57 = vmul.f32 %v3001_v52, %v2742_v36 }
 0x12f   : > { %v1572_v49 = vadd.f32 %v1540_v62, %v1472_v25  ;;  %v1742_v15 = vmax.f32 %v1710_v7, 0.0  ;;  %v1441_v8 = vmul.f32 %v2750_v43, %v3048_v22  ;;  %v756_v17 = vmin.f32 %v724_v14, 6.0  ;;  %v3074_v62 = vld [vmem:[#allocation2 + $0xa8] sm:$0xff] }
 0x130   : > { %v1073_v51 = vadd.f32 %v1041_v26, %v973_v53  ;;  %v1372_v24 = vadd.f32 %v1340_v57, %v1272_v6  ;;  %v1541_v30 = vmul.f32 %v2744_v37, %v2843_v10  ;;  %v1241_v58 = vmul.f32 %v2737_v32, %v2846_v19 }
 0x131   : > { %v1672_v27 = vadd.f32 %v1640_v47, %v1572_v49  ;;  %v1774_v31 = vmin.f32 %v1742_v15, 6.0  ;;  %789 = vst [vmem:[#allocation2 + $0x171] sm:$0xff] %v756_v17  ;;  %v677_v29 = vadd.f32 %v2714_v63, %v2976_v21  ;;  %v842_v34 = vmul.f32 %v2990_v42, %v2716_v0  ;;  %v3080_v21 = vld [vmem:[#allocation2 + $0xaa] sm:$0xff] }
 0x132   : > { %v1173_v20 = vadd.f32 %v1141_v1, %v1073_v51  ;;  %v1473_v38 = vadd.f32 %v1441_v8, %v1372_v24  ;;  %v1641_v13 = vmul.f32 %v2752_v44, %v3061_v12  ;;  %v942_v60 = vmul.f32 %v2718_v4, %v2821_v39  ;;  %v3095_v1 = vld [vmem:[#allocation2 + $0xb0] sm:$0xff] }
 0x133   : > { %v1711_v40 = vadd.f32 %v2856_v28, %v1672_v27  ;;  %2387 = vmatmul.mubr.f32.vlgmr.msra.gmra.mrb[0].mxu1 %v1774_v31  ;;  %v1341_v5 = vmul.f32 %v3039_v35, %v2742_v36  ;;  %v723_v2 = vmax.f32 %v677_v29, 0.0  ;;  %v1042_v42 = vmul.f32 %v3001_v52, %v2724_v11  ;;  %v908_v31 = vld [vmem:[#allocation2 + $0x99] sm:$0xff] }
 0x134   : > { %v1273_v48 = vadd.f32 %v1241_v58, %v1173_v20  ;;  %v1573_v16 = vadd.f32 %v1541_v30, %v1473_v38  ;;  %v974_v18 = vadd.f32 %v942_v60, %v842_v34  ;;  %v1142_v3 = vmul.f32 %v3048_v22, %v2747_v41 }
 0x135   : > { %v1743_v50 = vmax.f32 %v1711_v40, 0.0  ;;  %v1442_v39 = vmul.f32 %v2750_v43, %v3074_v62  ;;  %v1542_v25 = vmul.f32 %v2744_v37, %v2871_v55  ;;  %v3090_v61 = vmin.f32 %v723_v2, 6.0  ;;  %v3121_v2 = vld [vmem:[#allocation2 + $0xc0] sm:$0xff] }
 0x136   : > { %v1373_v59 = vadd.f32 %v1341_v5, %v1273_v48  ;;  %v1673_v7 = vadd.f32 %v1641_v13, %v1573_v16  ;;  %v1642_v52 = vmul.f32 %v2752_v44, %v3080_v21  ;;  %v1074_v14 = vadd.f32 %v1042_v42, %v974_v18  ;;  %v1607_v48 = vld [vmem:[#allocation2 + $0xb2] sm:$0xff] }
 0x137   : > { %v1775_v26 = vmin.f32 %v1743_v50, 6.0  ;;  %788 = vst [vmem:[#allocation2 + $0x169] sm:$0xff] %v3090_v61  ;;  %v692_v49 = vadd.f32 %v2996_v56, %v2714_v63  ;;  %v843_v47 = vmul.f32 %v3020_v23, %v2716_v0  ;;  %v943_v6 = vmul.f32 %v2718_v4, %v2846_v19 }
 0x138   : > { %v1474_v53 = vadd.f32 %v1442_v39, %v1373_v59  ;;  %v1712_v57 = vadd.f32 %v2856_v28, %v1673_v7  ;;  %v1174_v15 = vadd.f32 %v1142_v3, %v1074_v14  ;;  %v1242_v8 = vmul.f32 %v2737_v32, %v2843_v10  ;;  %v3130_v3 = vld [vmem:[#allocation2 + $0xc2] sm:$0xff]  ;;  %v1208_v14 = vld [vmem:[#allocation2 + $0xb1] sm:$0xff] }
 0x139   : > { %2389 = vmatprep.mubr.f32.mxu1 %v1775_v26  ;;  %v1043_v17 = vmul.f32 %v3039_v35, %v2724_v11  ;;  %v726_v27 = vmax.f32 %v692_v49, 0.0  ;;  %v975_v24 = vadd.f32 %v943_v6, %v843_v47  ;;  %v1143_v56 = vmul.f32 %v3074_v62, %v2747_v41 }
 0x13a   : > { %v1574_v51 = vadd.f32 %v1542_v25, %v1474_v53  ;;  %v1744_v23 = vmax.f32 %v1712_v57, 0.0  ;;  %v1274_v30 = vadd.f32 %v1242_v8, %v1174_v15  ;;  %v1342_v19 = vmul.f32 %v3061_v12, %v2742_v36  ;;  %v3144_v15 = vld [vmem:[#allocation2 + $0xc8] sm:$0xff] }
 0x13b   : > { %v1443_v58 = vmul.f32 %v2750_v43, %v3095_v1  ;;  %v1543_v10 = vmul.f32 %v2744_v37, %v2866_v46  ;;  %v758_v35 = vmin.f32 %v726_v27, 6.0  ;;  %v1075_v29 = vadd.f32 %v1043_v17, %v975_v24  ;;  %v3146_v8 = vld [vmem:[#allocation2 + $0xc9] sm:$0xff] }
 0x13c   : > { %v1674_v20 = vadd.f32 %v1642_v52, %v1574_v51  ;;  %v1776_v34 = vmin.f32 %v1744_v23, 6.0  ;;  %v1374_v40 = vadd.f32 %v1342_v19, %v1274_v30  ;;  %v1243_v38 = vmul.f32 %v2737_v32, %v2871_v55  ;;  %v3153_v23 = vld [vmem:[#allocation2 + $0xca] sm:$0xff] }
 0x13d   : > { %v687_v13 = vadd.f32 %v2714_v63, %v3003_v45  ;;  %791 = vst [vmem:[#allocation2 + $0x189] sm:$0xff] %v758_v35  ;;  %v1175_v5 = vadd.f32 %v1143_v56, %v1075_v29  ;;  %v844_v46 = vmul.f32 %v3048_v22, %v2716_v0  ;;  %v944_v42 = vmul.f32 %v2718_v4, %v908_v31  ;;  %v909_v22 = vld [vmem:[#allocation2 + $0xa9] sm:$0xff]  ;;  %v1209_v31 = vld [vmem:[#allocation2 + $0xc1] sm:$0xff] }
 0x13e   : > { %v1713_v60 = vadd.f32 %v2856_v28, %v1674_v20  ;;  %2390 = vmatmul.mubr.f32.gmra.mrb[2].mxu1 %v1776_v34  ;;  %v1475_v50 = vadd.f32 %v1443_v58, %v1374_v40  ;;  %v1343_v55 = vmul.f32 %v3080_v21, %v2742_v36  ;;  %v1044_v63 = vmul.f32 %v3061_v12, %v2724_v11 }
 0x13f   : > { %v725_v16 = vmax.f32 %v687_v13, 0.0  ;;  %v1275_v18 = vadd.f32 %v1243_v38, %v1175_v5  ;;  %v976_v59 = vadd.f32 %v944_v42, %v844_v46  ;;  %v1144_v39 = vmul.f32 %v3095_v1, %v2747_v41  ;;  %v3169_v46 = vld [vmem:[#allocation2 + $0xd8] sm:$0xff] }
 0x140   : > { %v1745_v45 = vmax.f32 %v1713_v60, 0.0  ;;  %v1575_v25 = vadd.f32 %v1543_v10, %v1475_v50  ;;  %v1643_v26 = vmul.f32 %v2752_v44, %v1607_v48  ;;  %v1444_v7 = vmul.f32 %v2750_v43, %v3121_v2  ;;  %v3171_v42 = vld [vmem:[#allocation2 + $0xd9] sm:$0xff] }
 0x141   : > { %v3137_v52 = vmin.f32 %v725_v16, 6.0  ;;  %v1375_v12 = vadd.f32 %v1343_v55, %v1275_v18  ;;  %v1544_v49 = vmul.f32 %v2744_v37, %v2885_v9  ;;  %v1076_v47 = vadd.f32 %v1044_v63, %v976_v59  ;;  %v3173_v50 = vld [vmem:[#allocation2 + $0xda] sm:$0xff] }
 0x142   : > { %v1777_v53 = vmin.f32 %v1745_v45, 6.0  ;;  %v1675_v6 = vadd.f32 %v1643_v26, %v1575_v25  ;;  %v1644_v57 = vmul.f32 %v2752_v44, %v3130_v3  ;;  %v845_v17 = vmul.f32 %v3074_v62, %v2716_v0 }
 0x143   : > { %790 = vst [vmem:[#allocation2 + $0x181] sm:$0xff] %v3137_v52  ;;  %v945_v51 = vmul.f32 %v2718_v4, %v909_v22  ;;  %v1476_v27 = vadd.f32 %v1444_v7, %v1375_v12  ;;  %v1176_v24 = vadd.f32 %v1144_v39, %v1076_v47  ;;  %v1244_v9 = vmul.f32 %v2737_v32, %v1208_v14 }
 0x144   : > { %2392 = vmatprep.mubr.f32.mxu1 %v1777_v53  ;;  %v1344_v56 = vmul.f32 %v1607_v48, %v2742_v36  ;;  %v1714_v30 = vadd.f32 %v2856_v28, %v1675_v6  ;;  %v1045_v58 = vmul.f32 %v3080_v21, %v2724_v11  ;;  %v1145_v62 = vmul.f32 %v3121_v2, %v2747_v41  ;;  %v3188_v53 = vld [vmem:[#allocation2 + $0xe0] sm:$0xff] }
 0x145   : > { %v977_v19 = vadd.f32 %v945_v51, %v845_v17  ;;  %v1576_v20 = vadd.f32 %v1544_v49, %v1476_v27  ;;  %v1276_v10 = vadd.f32 %v1244_v9, %v1176_v24  ;;  %v1445_v35 = vmul.f32 %v2750_v43, %v3144_v15  ;;  %v3196_v51 = vld [vmem:[#allocation2 + $0xe1] sm:$0xff] }
 0x146   : > { %v1545_v29 = vmul.f32 %v2744_v37, %v3146_v8  ;;  %v1746_v34 = vmax.f32 %v1714_v30, 0.0  ;;  %v1645_v40 = vmul.f32 %v2752_v44, %v3153_v23  ;;  %v846_v21 = vmul.f32 %v3095_v1, %v2716_v0  ;;  %v3198_v27 = vld [vmem:[#allocation2 + $0xe2] sm:$0xff] }
 0x147   : > { %v1077_v38 = vadd.f32 %v1045_v58, %v977_v19  ;;  %v1676_v13 = vadd.f32 %v1644_v57, %v1576_v20  ;;  %v1376_v60 = vadd.f32 %v1344_v56, %v1276_v10  ;;  %v1245_v5 = vmul.f32 %v2737_v32, %v1209_v31 }
 0x148   : > { %v946_v55 = vmul.f32 %v1208_v14, %v2718_v4  ;;  %v1778_v16 = vmin.f32 %v1746_v34, 6.0  ;;  %v1345_v45 = vmul.f32 %v3130_v3, %v2742_v36  ;;  %v1046_v18 = vmul.f32 %v1607_v48, %v2724_v11 }
 0x149   : > { %v1177_v63 = vadd.f32 %v1145_v62, %v1077_v38  ;;  %v1715_v1 = vadd.f32 %v2856_v28, %v1676_v13  ;;  %v1477_v59 = vadd.f32 %v1445_v35, %v1376_v60  ;;  %v1146_v22 = vmul.f32 %v3144_v15, %v2747_v41  ;;  %v3212_v38 = vld [vmem:[#allocation2 + $0xf0] sm:$0xff] }
 0x14a   : > { %v978_v39 = vadd.f32 %v946_v55, %v846_v21  ;;  %2393 = vmatmul.mubr.f32.gmra.mrb[4].mxu1 %v1778_v16  ;;  %v1446_v26 = vmul.f32 %v2750_v43, %v3169_v46  ;;  %v1546_v7 = vmul.f32 %v2744_v37, %v3171_v42  ;;  %v1646_v14 = vmul.f32 %v2752_v44, %v3173_v50  ;;  %v3220_v55 = vld [vmem:[#allocation2 + $0xf1] sm:$0xff] }
 0x14b   : > { %v1277_v25 = vadd.f32 %v1245_v5, %v1177_v63  ;;  %v1747_v48 = vmax.f32 %v1715_v1, 0.0  ;;  %v1577_v12 = vadd.f32 %v1545_v29, %v1477_v59  ;;  %v847_v47 = vmul.f32 %v3121_v2, %v2716_v0 }
 0x14c   : > { %v1078_v49 = vadd.f32 %v1046_v18, %v978_v39  ;;  %v1246_v57 = vmul.f32 %v3146_v8, %v2737_v32  ;;  %v1346_v17 = vmul.f32 %v3153_v23, %v2742_v36  ;;  %v947_v24 = vmul.f32 %v1209_v31, %v2718_v4  ;;  %v3224_v18 = vld [vmem:[#allocation2 + $0xf2] sm:$0xff] }
 0x14d   : > { %v1377_v6 = vadd.f32 %v1345_v45, %v1277_v25  ;;  %v1779_v9 = vmin.f32 %v1747_v48, 6.0  ;;  %v1677_v56 = vadd.f32 %v1645_v40, %v1577_v12  ;;  %v1447_v19 = vmul.f32 %v2750_v43, %v3188_v53 }
 0x14e   : > { %v1178_v30 = vadd.f32 %v1146_v22, %v1078_v49  ;;  %v979_v58 = vadd.f32 %v947_v24, %v847_v47  ;;  %v1047_v62 = vmul.f32 %v3130_v3, %v2724_v11  ;;  %v1147_v20 = vmul.f32 %v3169_v46, %v2747_v41  ;;  %v3243_v24 = vld [vmem:[#allocation2 + $0xf8] sm:$0xff] }
 0x14f   : > { %v1478_v2 = vadd.f32 %v1446_v26, %v1377_v6  ;;  %2395 = vmatprep.mubr.f32.mxu1 %v1779_v9  ;;  %v1716_v10 = vadd.f32 %v2856_v28, %v1677_v56  ;;  %v1547_v31 = vmul.f32 %v2744_v37, %v3196_v51  ;;  %v1647_v29 = vmul.f32 %v2752_v44, %v3198_v27  ;;  %v3245_v9 = vld [vmem:[#allocation2 + $0xf9] sm:$0xff] }
 0x150   : > { %v1278_v35 = vadd.f32 %v1246_v57, %v1178_v30  ;;  %v1079_v40 = vadd.f32 %v1047_v62, %v979_v58  ;;  %v848_v3 = vmul.f32 %v3144_v15, %v2716_v0  ;;  %v948_v21 = vmul.f32 %v3146_v8, %v2718_v4  ;;  %v3247_v30 = vld [vmem:[#allocation2 + $0xfa] sm:$0xff] }
 0x151   : > { %v1578_v34 = vadd.f32 %v1546_v7, %v1478_v2  ;;  %v1748_v13 = vmax.f32 %v1716_v10, 0.0  ;;  %v1247_v5 = vmul.f32 %v3171_v42, %v2737_v32  ;;  %v1048_v16 = vmul.f32 %v3153_v23, %v2724_v11 }
 0x152   : > { %v1378_v60 = vadd.f32 %v1346_v17, %v1278_v35  ;;  %v1179_v45 = vadd.f32 %v1147_v20, %v1079_v40  ;;  %v980_v1 = vadd.f32 %v948_v21, %v848_v3  ;;  %v1148_v15 = vmul.f32 %v3188_v53, %v2747_v41 }
 0x153   : > { %v1678_v63 = vadd.f32 %v1646_v14, %v1578_v34  ;;  %v1780_v59 = vmin.f32 %v1748_v13, 6.0  ;;  %v1347_v39 = vmul.f32 %v3173_v50, %v2742_v36  ;;  %v1448_v22 = vmul.f32 %v2750_v43, %v3212_v38 }
 0x154   : > { %v1479_v8 = vadd.f32 %v1447_v19, %v1378_v60  ;;  %v1279_v26 = vadd.f32 %v1247_v5, %v1179_v45  ;;  %v1548_v23 = vmul.f32 %v2744_v37, %v3220_v55  ;;  %v1080_v7 = vadd.f32 %v1048_v16, %v980_v1  ;;  %v3266_v5 = vld [vmem:[#allocation2 + $0x108] sm:$0xff] }
 0x155   : > { %v1717_v25 = vadd.f32 %v2856_v28, %v1678_v63  ;;  %2396 = vmatmul.mubr.f32.gmra.mrb[6].mxu1 %v1780_v59  ;;  %v1648_v48 = vmul.f32 %v2752_v44, %v3224_v18  ;;  %v849_v12 = vmul.f32 %v3169_v46, %v2716_v0  ;;  %v949_v49 = vmul.f32 %v3171_v42, %v2718_v4  ;;  %v3268_v16 = vld [vmem:[#allocation2 + $0x109] sm:$0xff] }
 0x156   : > { %v1579_v14 = vadd.f32 %v1547_v31, %v1479_v8  ;;  %v1379_v6 = vadd.f32 %v1347_v39, %v1279_v26  ;;  %v1180_v57 = vadd.f32 %v1148_v15, %v1080_v7  ;;  %v1248_v17 = vmul.f32 %v3196_v51, %v2737_v32  ;;  %v3274_v59 = vld [vmem:[#allocation2 + $0x10a] sm:$0xff] }
 0x157   : > { %v1749_v47 = vmax.f32 %v1717_v25, 0.0  ;;  %v981_v19 = vadd.f32 %v949_v49, %v849_v12  ;;  %v1049_v46 = vmul.f32 %v3173_v50, %v2724_v11  ;;  %v1149_v42 = vmul.f32 %v3212_v38, %v2747_v41 }
 0x158   : > { %v1679_v56 = vadd.f32 %v1647_v29, %v1579_v14  ;;  %v1480_v58 = vadd.f32 %v1448_v22, %v1379_v6  ;;  %v1280_v62 = vadd.f32 %v1248_v17, %v1180_v57  ;;  %v1348_v20 = vmul.f32 %v3198_v27, %v2742_v36  ;;  %v3291_v57 = vld [vmem:[#allocation2 + $0x110] sm:$0xff] }
 0x159   : > { %v1781_v2 = vmin.f32 %v1749_v47, 6.0  ;;  %v1449_v35 = vmul.f32 %v2750_v43, %v3243_v24  ;;  %v1549_v31 = vmul.f32 %v2744_v37, %v3245_v9  ;;  %v1081_v29 = vadd.f32 %v1049_v46, %v981_v19  ;;  %v3293_v17 = vld [vmem:[#allocation2 + $0x111] sm:$0xff] }
 0x15a   : > { %v1718_v10 = vadd.f32 %v2856_v28, %v1679_v56  ;;  %v1580_v50 = vadd.f32 %v1548_v23, %v1480_v58  ;;  %v1380_v34 = vadd.f32 %v1348_v20, %v1280_v62  ;;  %v1649_v40 = vmul.f32 %v2752_v44, %v3247_v30 }
 0x15b   : > { %2398 = vmatprep.mubr.f32.mxu1 %v1781_v2  ;;  %v850_v3 = vmul.f32 %v3188_v53, %v2716_v0  ;;  %v1181_v13 = vadd.f32 %v1149_v42, %v1081_v29  ;;  %v1249_v60 = vmul.f32 %v3220_v55, %v2737_v32  ;;  %v950_v63 = vmul.f32 %v3196_v51, %v2718_v4  ;;  %v3299_v2 = vld [vmem:[#allocation2 + $0x112] sm:$0xff] }
 0x15c   : > { %v1750_v21 = vmax.f32 %v1718_v10, 0.0  ;;  %v1680_v45 = vadd.f32 %v1648_v48, %v1580_v50  ;;  %v1481_v1 = vadd.f32 %v1449_v35, %v1380_v34  ;;  %v1349_v15 = vmul.f32 %v3224_v18, %v2742_v36 }
 0x15d   : > { %v1050_v53 = vmul.f32 %v3198_v27, %v2724_v11  ;;  %v1281_v39 = vadd.f32 %v1249_v60, %v1181_v13  ;;  %v982_v22 = vadd.f32 %v950_v63, %v850_v3  ;;  %v1150_v25 = vmul.f32 %v3243_v24, %v2747_v41  ;;  %v3316_v13 = vld [vmem:[#allocation2 + $0x120] sm:$0xff] }
 0x15e   : > { %v1782_v8 = vmin.f32 %v1750_v21, 6.0  ;;  %v1719_v26 = vadd.f32 %v2856_v28, %v1680_v45  ;;  %v1581_v23 = vadd.f32 %v1549_v31, %v1481_v1  ;;  %v1450_v51 = vmul.f32 %v2750_v43, %v3266_v5  ;;  %v3318_v60 = vld [vmem:[#allocation2 + $0x121] sm:$0xff] }
 0x15f   : > { %v1550_v7 = vmul.f32 %v2744_v37, %v3268_v16  ;;  %v1381_v14 = vadd.f32 %v1349_v15, %v1281_v39  ;;  %v1650_v27 = vmul.f32 %v2752_v44, %v3274_v59  ;;  %v1082_v48 = vadd.f32 %v1050_v53, %v982_v22  ;;  %v3320_v63 = vld [vmem:[#allocation2 + $0x122] sm:$0xff] }
 0x160   : > { %2399 = vmatmul.mubr.f32.gmra.mrb[8].mxu1 %v1782_v8  ;;  %v851_v12 = vmul.f32 %v3212_v38, %v2716_v0  ;;  %v1751_v49 = vmax.f32 %v1719_v26, 0.0  ;;  %v1681_v47 = vadd.f32 %v1649_v40, %v1581_v23  ;;  %v1250_v6 = vmul.f32 %v3245_v9, %v2737_v32  ;;  %v3331_v8 = vld [vmem:[%s3704_s4] ss:$0 sm:$0xff] }
 0x161   : > { %v951_v56 = vmul.f32 %v3220_v55, %v2718_v4  ;;  %v1482_v19 = vadd.f32 %v1450_v51, %v1381_v14  ;;  %v1182_v46 = vadd.f32 %v1150_v25, %v1082_v48  ;;  %v1350_v42 = vmul.f32 %v3247_v30, %v2742_v36 }
 0x162   : > { %v1051_v38 = vmul.f32 %v3224_v18, %v2724_v11  ;;  %v1783_v58 = vmin.f32 %v1751_v49, 6.0  ;;  %v1720_v62 = vadd.f32 %v2856_v28, %v1681_v47  ;;  %v1151_v10 = vmul.f32 %v3266_v5, %v2747_v41 }
 0x163   : > { %v983_v20 = vadd.f32 %v951_v56, %v851_v12  ;;  %v1582_v35 = vadd.f32 %v1550_v7, %v1482_v19  ;;  %v1282_v31 = vadd.f32 %v1250_v6, %v1182_v46  ;;  %v1451_v55 = vmul.f32 %v2750_v43, %v3291_v57  ;;  %v3342_v7 = vld [vmem:[#allocation2 + $0x128] sm:$0xff] }
 0x164   : > { %v1551_v29 = vmul.f32 %v2744_v37, %v3293_v17  ;;  %2401 = vmatprep.mubr.f32.mxu1 %v1783_v58  ;;  %v1752_v50 = vmax.f32 %v1720_v62, 0.0  ;;  %v1651_v18 = vmul.f32 %v2752_v44, %v3299_v2  ;;  %v852_v28 = vmul.f32 %v3243_v24, %v2716_v0  ;;  %v3350_v56 = vld [vmem:[#allocation2 + $0x129] sm:$0xff] }
 0x165   : > { %v1083_v34 = vadd.f32 %v1051_v38, %v983_v20  ;;  %v1682_v40 = vadd.f32 %v1650_v27, %v1582_v35  ;;  %v1382_v3 = vadd.f32 %v1350_v42, %v1282_v31  ;;  %v1251_v21 = vmul.f32 %v3268_v16, %v2737_v32  ;;  %v3352_v19 = vld [vmem:[#allocation2 + $0x12a] sm:$0xff] }
 0x166   : > { %v952_v45 = vmul.f32 %v3245_v9, %v2718_v4  ;;  %v1784_v1 = vmin.f32 %v1752_v50, 6.0  ;;  %v1351_v53 = vmul.f32 %v3274_v59, %v2742_v36  ;;  %v1052_v24 = vmul.f32 %v3247_v30, %v2724_v11 }
 0x167   : > { %v1183_v15 = vadd.f32 %v1151_v10, %v1083_v34  ;;  %v1721_v39 = vadd.f32 %v3331_v8, %v1682_v40  ;;  %v1483_v22 = vadd.f32 %v1451_v55, %v1382_v3  ;;  %v1152_v9 = vmul.f32 %v3291_v57, %v2747_v41  ;;  %v3367_v34 = vld [vmem:[#allocation2 + $0x138] sm:$0xff] }
 0x168   : > { %v984_v25 = vadd.f32 %v952_v45, %v852_v28  ;;  %2402 = vmatmul.mubr.f32.gmra.mrb[10].mxu1 %v1784_v1  ;;  %v1452_v23 = vmul.f32 %v2750_v43, %v3316_v13  ;;  %v1552_v30 = vmul.f32 %v2744_v37, %v3318_v60  ;;  %v1652_v51 = vmul.f32 %v2752_v44, %v3320_v63 }
 0x169   : > { %v1283_v26 = vadd.f32 %v1251_v21, %v1183_v15  ;;  %v1753_v14 = vmax.f32 %v1721_v39, 0.0  ;;  %v1583_v27 = vadd.f32 %v1551_v29, %v1483_v22  ;;  %v853_v12 = vmul.f32 %v3266_v5, %v2716_v0 }
 0x16a   : > { %v1084_v48 = vadd.f32 %v1052_v24, %v984_v25  ;;  %v1252_v47 = vmul.f32 %v3293_v17, %v2737_v32  ;;  %v1352_v6 = vmul.f32 %v3299_v2, %v2742_v36  ;;  %v953_v46 = vmul.f32 %v3268_v16, %v2718_v4 }
 0x16b   : > { %v1383_v49 = vadd.f32 %v1351_v53, %v1283_v26  ;;  %v1785_v42 = vmin.f32 %v1753_v14, 6.0  ;;  %v1683_v38 = vadd.f32 %v1651_v18, %v1583_v27  ;;  %v1453_v5 = vmul.f32 %v2750_v43, %v3342_v7  ;;  %v3377_v53 = vld [vmem:[#allocation2 + $0x13a] sm:$0xff] }
 0x16c   : > { %v1184_v58 = vadd.f32 %v1152_v9, %v1084_v48  ;;  %v985_v20 = vadd.f32 %v953_v46, %v853_v12  ;;  %v1053_v10 = vmul.f32 %v3274_v59, %v2724_v11  ;;  %v1153_v35 = vmul.f32 %v3316_v13, %v2747_v41 }
 0x16d   : > { %v1484_v62 = vadd.f32 %v1452_v23, %v1383_v49  ;;  %2404 = vmatprep.mubr.f32.mxu1 %v1785_v42  ;;  %v1722_v31 = vadd.f32 %v3331_v8, %v1683_v38  ;;  %v1553_v16 = vmul.f32 %v2744_v37, %v3350_v56  ;;  %v1653_v29 = vmul.f32 %v2752_v44, %v3352_v19  ;;  %v3400_v42 = vld [vmem:[#allocation2 + $0x142] sm:$0xff] }
 0x16e   : > { %v1284_v55 = vadd.f32 %v1252_v47, %v1184_v58  ;;  %v1085_v18 = vadd.f32 %v1053_v10, %v985_v20  ;;  %v854_v59 = vmul.f32 %v3291_v57, %v2716_v0  ;;  %v954_v28 = vmul.f32 %v3293_v17, %v2718_v4  ;;  %v1219_v10 = vld [vmem:[#allocation2 + $0x139] sm:$0xff] }
 0x16f   : > { %v1584_v50 = vadd.f32 %v1552_v30, %v1484_v62  ;;  %v1754_v40 = vmax.f32 %v1722_v31, 0.0  ;;  %v1253_v21 = vmul.f32 %v3318_v60, %v2737_v32  ;;  %v1054_v45 = vmul.f32 %v3299_v2, %v2724_v11 }
 0x170   : > { %v1384_v3 = vadd.f32 %v1352_v6, %v1284_v55  ;;  %v1185_v15 = vadd.f32 %v1153_v35, %v1085_v18  ;;  %v986_v24 = vadd.f32 %v954_v28, %v854_v59  ;;  %v1154_v39 = vmul.f32 %v3342_v7, %v2747_v41  ;;  %v3396_v6 = vld [vmem:[#allocation2 + $0x140] sm:$0xff] }
 0x171   : > { %v1684_v1 = vadd.f32 %v1652_v51, %v1584_v50  ;;  %v1786_v57 = vmin.f32 %v1754_v40, 6.0  ;;  %v1353_v17 = vmul.f32 %v3320_v63, %v2742_v36  ;;  %v1454_v25 = vmul.f32 %v2750_v43, %v3367_v34 }
 0x172   : > { %v1485_v22 = vadd.f32 %v1453_v5, %v1384_v3  ;;  %v1285_v26 = vadd.f32 %v1253_v21, %v1185_v15  ;;  %v1554_v2 = vmul.f32 %v2744_v37, %v2982_v33  ;;  %v1086_v23 = vadd.f32 %v1054_v45, %v986_v24  ;;  %v3398_v33 = vld [vmem:[#allocation2 + $0x141] sm:$0xff]  ;;  %v3418_v3 = vld [vmem:[#allocation2 + $0x150] sm:$0xff] }
 0x173   : > { %v1723_v9 = vadd.f32 %v3331_v8, %v1684_v1  ;;  %2405 = vmatmul.mubr.f32.gmra.mrb[12].mxu1 %v1786_v57  ;;  %v1654_v51 = vmul.f32 %v2752_v44, %v3377_v53  ;;  %v855_v14 = vmul.f32 %v3316_v13, %v2716_v0  ;;  %v955_v27 = vmul.f32 %v3318_v60, %v2718_v4  ;;  %v3424_v24 = vld [vmem:[#allocation2 + $0x152] sm:$0xff] }
 0x174   : > { %v1585_v30 = vadd.f32 %v1553_v16, %v1485_v22  ;;  %v1385_v12 = vadd.f32 %v1353_v17, %v1285_v26  ;;  %v1186_v49 = vadd.f32 %v1154_v39, %v1086_v23  ;;  %v1254_v47 = vmul.f32 %v3350_v56, %v2737_v32 }
 0x175   : > { %v1755_v48 = vmax.f32 %v1723_v9, 0.0  ;;  %v987_v38 = vadd.f32 %v955_v27, %v855_v14  ;;  %v1055_v13 = vmul.f32 %v3320_v63, %v2724_v11  ;;  %v1155_v60 = vmul.f32 %v3367_v34, %v2747_v41 }
 0x176   : > { %v1685_v46 = vadd.f32 %v1653_v29, %v1585_v30  ;;  %v1486_v5 = vadd.f32 %v1454_v25, %v1385_v12  ;;  %v1286_v62 = vadd.f32 %v1254_v47, %v1186_v49  ;;  %v1354_v20 = vmul.f32 %v3352_v19, %v2742_v36  ;;  %v3443_v12 = vld [vmem:[#allocation2 + $0x159] sm:$0xff] }
 0x177   : > { %v1787_v58 = vmin.f32 %v1755_v48, 6.0  ;;  %v1455_v31 = vmul.f32 %v2750_v43, %v3396_v6  ;;  %v1555_v55 = vmul.f32 %v2744_v37, %v3398_v33  ;;  %v1087_v16 = vadd.f32 %v1055_v13, %v987_v38  ;;  %v3441_v48 = vld [vmem:[#allocation2 + $0x158] sm:$0xff] }
 0x178   : > { %v1724_v35 = vadd.f32 %v3331_v8, %v1685_v46  ;;  %v1586_v63 = vadd.f32 %v1554_v2, %v1486_v5  ;;  %v1386_v29 = vadd.f32 %v1354_v20, %v1286_v62  ;;  %v1655_v50 = vmul.f32 %v2752_v44, %v3400_v42  ;;  %v3448_v38 = vld [vmem:[#allocation2 + $0x15a] sm:$0xff]  ;;  %v1221_v62 = vld [vmem:[#allocation2 + $0x151] sm:$0xff] }
 0x179   : > { %2407 = vmatprep.mubr.f32.mxu1 %v1787_v58  ;;  %v856_v18 = vmul.f32 %v3342_v7, %v2716_v0  ;;  %v1187_v28 = vadd.f32 %v1155_v60, %v1087_v16  ;;  %v1255_v40 = vmul.f32 %v2737_v32, %v1219_v10  ;;  %v956_v21 = vmul.f32 %v3350_v56, %v2718_v4 }
 0x17a   : > { %v1756_v59 = vmax.f32 %v1724_v35, 0.0  ;;  %v1686_v45 = vadd.f32 %v1654_v51, %v1586_v63  ;;  %v1487_v1 = vadd.f32 %v1455_v31, %v1386_v29  ;;  %v1355_v15 = vmul.f32 %v3377_v53, %v2742_v36 }
 0x17b   : > { %v1056_v39 = vmul.f32 %v3352_v19, %v2724_v11  ;;  %v1287_v57 = vadd.f32 %v1255_v40, %v1187_v28  ;;  %v988_v22 = vadd.f32 %v956_v21, %v856_v18  ;;  %v1156_v17 = vmul.f32 %v3396_v6, %v2747_v41  ;;  %v3466_v28 = vld [vmem:[#allocation2 + $0x16a] sm:$0xff] }
 0x17c   : > { %v1788_v7 = vmin.f32 %v1756_v59, 6.0  ;;  %v1725_v25 = vadd.f32 %v3331_v8, %v1686_v45  ;;  %v1587_v9 = vadd.f32 %v1555_v55, %v1487_v1  ;;  %v1456_v56 = vmul.f32 %v2750_v43, %v3418_v3  ;;  %v3464_v59 = vld [vmem:[#allocation2 + $0x168] sm:$0xff] }
 0x17d   : > { %v1556_v26 = vmul.f32 %v2744_v37, %v3035_v54  ;;  %v1387_v2 = vadd.f32 %v1355_v15, %v1287_v57  ;;  %v1656_v19 = vmul.f32 %v2752_v44, %v3424_v24  ;;  %v1088_v23 = vadd.f32 %v1056_v39, %v988_v22 }
 0x17e   : > { %2408 = vmatmul.mubr.f32.gmra.mrb[14].mxu1 %v1788_v7  ;;  %v857_v30 = vmul.f32 %v3367_v34, %v2716_v0  ;;  %v1757_v51 = vmax.f32 %v1725_v25, 0.0  ;;  %v1687_v14 = vadd.f32 %v1655_v50, %v1587_v9  ;;  %v1256_v27 = vmul.f32 %v3398_v33, %v2737_v32  ;;  %v3483_v9 = vld [vmem:[#allocation2 + $0x170] sm:$0xff] }
 0x17f   : > { %v957_v54 = vmul.f32 %v1219_v10, %v2718_v4  ;;  %v1488_v49 = vadd.f32 %v1456_v56, %v1387_v2  ;;  %v1188_v47 = vadd.f32 %v1156_v17, %v1088_v23  ;;  %v1356_v46 = vmul.f32 %v3400_v42, %v2742_v36 }
 0x180   : > { %v1057_v34 = vmul.f32 %v3377_v53, %v2724_v11  ;;  %v1789_v13 = vmin.f32 %v1757_v51, 6.0  ;;  %v1726_v60 = vadd.f32 %v3331_v8, %v1687_v14  ;;  %v1157_v5 = vmul.f32 %v3418_v3, %v2747_v41  ;;  %v3491_v51 = vld [vmem:[#allocation2 + $0x171] sm:$0xff] }
 0x181   : > { %v989_v58 = vadd.f32 %v957_v54, %v857_v30  ;;  %v1588_v20 = vadd.f32 %v1556_v26, %v1488_v49  ;;  %v1288_v10 = vadd.f32 %v1256_v27, %v1188_v47  ;;  %v1457_v35 = vmul.f32 %v2750_v43, %v3441_v48 }
 0x182   : > { %v1557_v31 = vmul.f32 %v2744_v37, %v3443_v12  ;;  %2410 = vmatprep.mubr.f32.mxu1 %v1789_v13  ;;  %v1758_v55 = vmax.f32 %v1726_v60, 0.0  ;;  %v1657_v53 = vmul.f32 %v2752_v44, %v3448_v38  ;;  %v858_v63 = vmul.f32 %v3396_v6, %v2716_v0  ;;  %v1223_v60 = vld [vmem:[#allocation2 + $0x169] sm:$0xff] }
 0x183   : > { %v1089_v16 = vadd.f32 %v1057_v34, %v989_v58  ;;  %v1688_v29 = vadd.f32 %v1656_v19, %v1588_v20  ;;  %v1388_v50 = vadd.f32 %v1356_v46, %v1288_v10  ;;  %v1257_v18 = vmul.f32 %v2737_v32, %v1221_v62 }
 0x184   : > { %v958_v40 = vmul.f32 %v3398_v33, %v2718_v4  ;;  %v1790_v21 = vmin.f32 %v1758_v55, 6.0  ;;  %v1357_v1 = vmul.f32 %v3424_v24, %v2742_v36  ;;  %v1058_v15 = vmul.f32 %v3400_v42, %v2724_v11 }
 0x185   : > { %v1189_v45 = vadd.f32 %v1157_v5, %v1089_v16  ;;  %v1727_v6 = vadd.f32 %v3331_v8, %v1688_v29  ;;  %v1489_v39 = vadd.f32 %v1457_v35, %v1388_v50  ;;  %v1158_v57 = vmul.f32 %v3441_v48, %v2747_v41 }
 0x186   : > { %v990_v7 = vadd.f32 %v958_v40, %v858_v63  ;;  %2411 = vmatmul.mubr.f32.gmra.mrb[16].mxu1 %v1790_v21  ;;  %v1458_v33 = vmul.f32 %v2750_v43, %v3464_v59  ;;  %v1558_v17 = vmul.f32 %v2744_v37, %v3090_v61  ;;  %v1658_v25 = vmul.f32 %v2752_v44, %v3466_v28  ;;  %v3493_v61 = vld [vmem:[#allocation2 + $0x172] sm:$0xff]  ;;  %v1624_v40 = vld [vmem:[#allocation2 + $0x182] sm:$0xff] }
 0x187   : > { %v1289_v22 = vadd.f32 %v1257_v18, %v1189_v45  ;;  %v1759_v42 = vmax.f32 %v1727_v6, 0.0  ;;  %v1589_v56 = vadd.f32 %v1557_v31, %v1489_v39  ;;  %v859_v2 = vmul.f32 %v3418_v3, %v2716_v0  ;;  %v1424_v31 = vld [vmem:[#allocation2 + $0x180] sm:$0xff] }
 0x188   : > { %v1090_v26 = vadd.f32 %v1058_v15, %v990_v7  ;;  %v1258_v23 = vmul.f32 %v3443_v12, %v2737_v32  ;;  %v1358_v30 = vmul.f32 %v3448_v38, %v2742_v36  ;;  %v959_v14 = vmul.f32 %v1221_v62, %v2718_v4 }
 0x189   : > { %v1389_v19 = vadd.f32 %v1357_v1, %v1289_v22  ;;  %v1791_v27 = vmin.f32 %v1759_v42, 6.0  ;;  %v1689_v54 = vadd.f32 %v1657_v53, %v1589_v56  ;;  %v1459_v47 = vmul.f32 %v2750_v43, %v3483_v9 }
 0x18a   : > { %v1190_v49 = vadd.f32 %v1158_v57, %v1090_v26  ;;  %v991_v46 = vadd.f32 %v959_v14, %v859_v2  ;;  %v1059_v34 = vmul.f32 %v3424_v24, %v2724_v11  ;;  %v1159_v13 = vmul.f32 %v3464_v59, %v2747_v41  ;;  %v1425_v2 = vld [vmem:[#allocation2 + $0x188] sm:$0xff] }
 0x18b   : > { %v1490_v3 = vadd.f32 %v1458_v33, %v1389_v19  ;;  %2413 = vmatprep.mubr.f32.mxu1 %v1791_v27  ;;  %v1728_v58 = vadd.f32 %v3331_v8, %v1689_v54  ;;  %v1559_v62 = vmul.f32 %v2744_v37, %v3491_v51  ;;  %v1659_v20 = vmul.f32 %v2752_v44, %v3493_v61  ;;  %v1525_v19 = vld [vmem:[#allocation2 + $0x189] sm:$0xff]  ;;  %v1225_v27 = vld [vmem:[#allocation2 + $0x181] sm:$0xff] }
 0x18c   : > { %v1290_v5 = vadd.f32 %v1258_v23, %v1190_v49  ;;  %v1091_v35 = vadd.f32 %v1059_v34, %v991_v46  ;;  %v860_v24 = vmul.f32 %v3441_v48, %v2716_v0  ;;  %v960_v55 = vmul.f32 %v3443_v12, %v2718_v4 }
 0x18d   : > { %v1590_v10 = vadd.f32 %v1558_v17, %v1490_v3  ;;  %v1760_v53 = vmax.f32 %v1728_v58, 0.0  ;;  %v1259_v63 = vmul.f32 %v2737_v32, %v1223_v60  ;;  %v1060_v29 = vmul.f32 %v3448_v38, %v2724_v11 }
 0x18e   : > { %v1390_v16 = vadd.f32 %v1358_v30, %v1290_v5  ;;  %v1191_v18 = vadd.f32 %v1159_v13, %v1091_v35  ;;  %v992_v21 = vadd.f32 %v960_v55, %v860_v24  ;;  %v1160_v45 = vmul.f32 %v3483_v9, %v2747_v41 }
 0x18f   : > { %v1690_v50 = vadd.f32 %v1658_v25, %v1590_v10  ;;  %v1792_v1 = vmin.f32 %v1760_v53, 6.0  ;;  %v1359_v48 = vmul.f32 %v3466_v28, %v2742_v36  ;;  %v1460_v12 = vmul.f32 %v2750_v43, %v1424_v31  ;;  %v2483_v53 = vld [vmem:[#allocation2] sm:$0xff] }
 0x190   : > { %v1491_v15 = vadd.f32 %v1459_v47, %v1390_v16  ;;  %v1291_v39 = vadd.f32 %v1259_v63, %v1191_v18  ;;  %v1560_v38 = vmul.f32 %v2744_v37, %v3137_v52  ;;  %v1092_v7 = vadd.f32 %v1060_v29, %v992_v21  ;;  %v1526_v63 = vld [vmem:[#allocation2 + $0x199] sm:$0xff] }
 0x191   : > { %v1729_v6 = vadd.f32 %v3331_v8, %v1690_v50  ;;  %2414 = vmatmul.mubr.f32.gmra.mrb[18].mxu1 %v1792_v1  ;;  %v1660_v22 = vmul.f32 %v2752_v44, %v1624_v40  ;;  %v861_v33 = vmul.f32 %v3464_v59, %v2716_v0  ;;  %v961_v17 = vmul.f32 %v1223_v60, %v2718_v4 }
 0x192   : > { %v1591_v57 = vadd.f32 %v1559_v62, %v1491_v15  ;;  %v1391_v42 = vadd.f32 %v1359_v48, %v1291_v39  ;;  %v1192_v56 = vadd.f32 %v1160_v45, %v1092_v7  ;;  %v1260_v26 = vmul.f32 %v3491_v51, %v2737_v32 }
 0x193   : > { %v1761_v25 = vmax.f32 %v1729_v6, 0.0  ;;  %v993_v52 = vadd.f32 %v961_v17, %v861_v33  ;;  %v1061_v30 = vmul.f32 %v3466_v28, %v2724_v11  ;;  %v1161_v14 = vmul.f32 %v1424_v31, %v2747_v41  ;;  %v1627_v17 = vld [vmem:[#allocation2 + $0x1a2] sm:$0xff] }
 0x194   : > { %v1691_v23 = vadd.f32 %v1659_v20, %v1591_v57  ;;  %v1492_v59 = vadd.f32 %v1460_v12, %v1391_v42  ;;  %v1292_v49 = vadd.f32 %v1260_v26, %v1192_v56  ;;  %v1360_v47 = vmul.f32 %v3493_v61, %v2742_v36  ;;  %v1625_v20 = vld [vmem:[#allocation2 + $0x18a] sm:$0xff] }
 0x195   : > { %v1793_v54 = vmin.f32 %v1761_v25, 6.0  ;;  %v1461_v46 = vmul.f32 %v2750_v43, %v1425_v2  ;;  %v1561_v34 = vmul.f32 %v2744_v37, %v1525_v19  ;;  %v1093_v13 = vadd.f32 %v1061_v30, %v993_v52 }
 0x196   : > { %v1730_v3 = vadd.f32 %v3331_v8, %v1691_v23  ;;  %v1592_v60 = vadd.f32 %v1560_v38, %v1492_v59  ;;  %v1392_v58 = vadd.f32 %v1360_v47, %v1292_v49  ;;  %v1261_v28 = vmul.f32 %v2737_v32, %v1225_v27  ;;  %v1527_v38 = vld [vmem:[#allocation2 + $0x1a1] sm:$0xff] }
 0x197   : > { %2416 = vmatprep.mubr.f32.mxu1 %v1793_v54  ;;  %v862_v5 = vmul.f32 %v3483_v9, %v2716_v0  ;;  %v1193_v10 = vadd.f32 %v1161_v14, %v1093_v13  ;;  %v1361_v35 = vmul.f32 %v1624_v40, %v2742_v36  ;;  %v962_v31 = vmul.f32 %v3491_v51, %v2718_v4  ;;  %v1626_v4 = vld [vmem:[#allocation2 + $0x19a] sm:$0xff]  ;;  %v2484_v47 = vld [vmem:[%s2594_s9 + $0x8] sm:$0xff] }
 0x198   : > { %v1762_v62 = vmax.f32 %v1730_v3, 0.0  ;;  %v1692_v24 = vadd.f32 %v1660_v22, %v1592_v60  ;;  %v1493_v55 = vadd.f32 %v1461_v46, %v1392_v58  ;;  %v1462_v16 = vmul.f32 %v2483_v53, %v2750_v43  ;;  %v2485_v46 = vld [vmem:[%s2594_s9] sm:$0xff]  ;;  %v2488_v53 = vld [vmem:[%s2594_s9 + $0x28] sm:$0xff] }
 0x199   : > { %v1062_v29 = vmul.f32 %v3493_v61, %v2724_v11  ;;  %v1293_v18 = vadd.f32 %v1261_v28, %v1193_v10  ;;  %v994_v0 = vadd.f32 %v962_v31, %v862_v5  ;;  %v1162_v9 = vmul.f32 %v1425_v2, %v2747_v41  ;;  %v2486_v5 = vld [vmem:[%s2594_s9 + $0x18] sm:$0xff] }
 0x19a   : > { %v1794_v50 = vmin.f32 %v1762_v62, 6.0  ;;  %v1731_v21 = vadd.f32 %v3331_v8, %v1692_v24  ;;  %v1593_v40 = vadd.f32 %v1561_v34, %v1493_v55  ;;  %v1661_v45 = vmul.f32 %v2752_v44, %v1625_v20 }
 0x19b   : > { %v1393_v51 = vadd.f32 %v1361_v35, %v1293_v18  ;;  %v1562_v1 = vmul.f32 %v2744_v37, %v1526_v63  ;;  %v1094_v43 = vadd.f32 %v1062_v29, %v994_v0  ;;  %v1662_v11 = vmul.f32 %v2752_v44, %v1626_v4  ;;  %v2489_v63 = vld [vmem:[%s2594_s9 + $0x20] sm:$0xff] }
 0x19c   : > { %2417 = vmatmul.mubr.f32.gmra.mrb[20].mxu1 %v1794_v50  ;;  %v1763_v15 = vmax.f32 %v1731_v21, 0.0  ;;  %v1693_v48 = vadd.f32 %v1661_v45, %v1593_v40  ;;  %v1262_v6 = vmul.f32 %v1525_v19, %v2737_v32  ;;  %v1362_v22 = vmul.f32 %v1625_v20, %v2742_v36  ;;  %v2487_v20 = vld [vmem:[%s2594_s9 + $0x10] sm:$0xff]  ;;  %v2490_v21 = vld [vmem:[%s2594_s9 + $0x38] sm:$0xff] }
 0x19d   : > { %v1494_v12 = vadd.f32 %v1462_v16, %v1393_v51  ;;  %v1194_v61 = vadd.f32 %v1162_v9, %v1094_v43  ;;  %v1563_v56 = vmul.f32 %v2744_v37, %v1527_v38  ;;  %v1663_v32 = vmul.f32 %v2752_v44, %v1627_v17  ;;  %v3560_v37 = vld [vmem:[%s3706_s6] ss:$0 sm:$0xff]  ;;  %v2491_v45 = vld [vmem:[%s2594_s9 + $0x30] sm:$0xff] }
 0x19e   : > { %v1795_v41 = vmin.f32 %v1763_v15, 6.0  ;;  %v1732_v39 = vadd.f32 %v3331_v8, %v1693_v48  ;;  %v2492_v48 = vld [vmem:[%s2594_s9 + $0x48] sm:$0xff] }
 0x19f   : > { %v1594_v7 = vadd.f32 %v1562_v1, %v1494_v12  ;;  %v1294_v57 = vadd.f32 %v1262_v6, %v1194_v61 }
 0x1a0   : > { %2419 = vmatprep.mubr.f32.mxu1 %v1795_v41  ;;  %v1764_v33 = vmax.f32 %v1732_v39, 0.0 }
 0x1a1   : > { %v1694_v25 = vadd.f32 %v1662_v11, %v1594_v7  ;;  %v1394_v42 = vadd.f32 %v1362_v22, %v1294_v57  ;;  %v2493_v11 = vld [vmem:[%s2594_s9 + $0x40] sm:$0xff]  ;;  %v2494_v7 = vld [vmem:[%s2594_s9 + $0x58] sm:$0xff]  ;;  %v2495_v22 = vld [vmem:[%s2594_s9 + $0x50] sm:$0xff] }
 0x1a2   : > { %v1796_v26 = vmin.f32 %v1764_v33, 6.0 }
 0x1a3   : > { %v1733_v2 = vadd.f32 %v3331_v8, %v1694_v25  ;;  %v1495_v23 = vadd.f32 %v1462_v16, %v1394_v42 }
 0x1a4   : > { %2420 = vmatmul.mubr.f32.gmra.mrb[22].mxu1 %v1796_v26  ;;  %v2496_v26 = vld [vmem:[%s2594_s9 + $0x68] sm:$0xff] }
 0x1a5   : > { %v1765_v19 = vmax.f32 %v1733_v2, 0.0  ;;  %v1595_v52 = vadd.f32 %v1563_v56, %v1495_v23  ;;  %v2497_v23 = vld [vmem:[%s2594_s9 + $0x60] sm:$0xff] }
 0x1a7   : > { %v1797_v36 = vmin.f32 %v1765_v19, 6.0  ;;  %v1695_v30 = vadd.f32 %v1663_v32, %v1595_v52 }
 0x1a9   : > { %2422 = vmatprep.mubr.f32.mxu1 %v1797_v36  ;;  %v1734_v14 = vadd.f32 %v3331_v8, %v1695_v30 }
 0x1ab   : > { %v1766_v27 = vmax.f32 %v1734_v14, 0.0  ;;  %v2498_v14 = vld [vmem:[%s2594_s9 + $0x78] sm:$0xff] }
 0x1ad   : > { %v1798_v54 = vmin.f32 %v1766_v27, 6.0 }
 0x1af   : > { %2423 = vmatmul.mubr.f32.gmra.mrb[24].mxu1 %v1798_v54  ;;  %v2499_v54 = vld [vmem:[%s2594_s9 + $0x70] sm:$0xff] }
 0x1dd   : > { %v2379_v44 = vpop.f32.mrb[32].mxu0 }
 0x1de   : > { %v1894_v59 = vadd.f32 %v2379_v44, %v3560_v37  ;;  %v1888_v49 = vpop.f32.mrb[33].mxu0 }
 0x1df   : > { %v1889_v8 = vadd.f32 %v3560_v37, %v1888_v49 }
 0x1e0   : > { %v2048_v3 = vadd.f32 %v2484_v47, %v1894_v59 }
 0x1e1   : > { %v2047_v34 = vadd.f32 %v2485_v46, %v1889_v8 }
 0x1e2   : > { %2080 = vst.msk [vmem:[%s3568_s20 + $0x8] sm:$0xff] %vm373_vm0, %v2048_v3  ;;  %v2500_v3 = vld [vmem:[%s2594_s9 + $0x88] sm:$0xff] }
 0x1e3   : > { %2079 = vst.msk [vmem:[%s3568_s20] sm:$0xff] %vm373_vm0, %v2047_v34  ;;  %v2501_v34 = vld [vmem:[%s2594_s9 + $0x80] sm:$0xff] }
 0x1ea   : > { %v2382_v13 = vpop.f32.mrb[34].mxu0 }
 0x1eb   : > { %v1904_v60 = vadd.f32 %v2382_v13, %v3560_v37  ;;  %v1898_v58 = vpop.f32.mrb[35].mxu0 }
 0x1ec   : > { %v1899_v28 = vadd.f32 %v3560_v37, %v1898_v58 }
 0x1ed   : > { %v2050_v62 = vadd.f32 %v2486_v5, %v1904_v60 }
 0x1ee   : > { %v2049_v10 = vadd.f32 %v2487_v20, %v1899_v28 }
 0x1ef   : > { %2082 = vst.msk [vmem:[%s3568_s20 + $0x18] sm:$0xff] %vm373_vm0, %v2050_v62  ;;  %v2502_v62 = vld [vmem:[%s2594_s9 + $0x98] sm:$0xff] }
 0x1f0   : > { %2081 = vst.msk [vmem:[%s3568_s20 + $0x10] sm:$0xff] %vm373_vm0, %v2049_v10  ;;  %v2503_v10 = vld [vmem:[%s2594_s9 + $0x90] sm:$0xff] }
 0x1fb   : > { %v2385_v35 = vpop.f32.mrb[36].mxu0 }
 0x1fc   : > { %v1914_v31 = vadd.f32 %v2385_v35, %v3560_v37  ;;  %v1908_v24 = vpop.f32.mrb[37].mxu0 }
 0x1fd   : > { %v1909_v55 = vadd.f32 %v3560_v37, %v1908_v24 }
 0x1fe   : > { %v2052_v16 = vadd.f32 %v2488_v53, %v1914_v31 }
 0x1ff   : > { %v2051_v29 = vadd.f32 %v2489_v63, %v1909_v55 }
 0x200   : > { %2084 = vst.msk [vmem:[%s3568_s20 + $0x28] sm:$0xff] %vm373_vm0, %v2052_v16  ;;  %v2504_v16 = vld [vmem:[%s2594_s9 + $0xa8] sm:$0xff] }
 0x201   : > { %2083 = vst.msk [vmem:[%s3568_s20 + $0x20] sm:$0xff] %vm373_vm0, %v2051_v29  ;;  %v2505_v29 = vld [vmem:[%s2594_s9 + $0xa0] sm:$0xff] }
 0x206   : > { %v2388_v50 = vpop.f32.mrb[0].mxu1 }
 0x207   : > { %v1924_v18 = vadd.f32 %v2388_v50, %v3560_v37  ;;  %v1918_v0 = vpop.f32.mrb[1].mxu1 }
 0x208   : > { %v1919_v9 = vadd.f32 %v3560_v37, %v1918_v0 }
 0x209   : > { %v2054_v40 = vadd.f32 %v2490_v21, %v1924_v18 }
 0x20a   : > { %v2053_v4 = vadd.f32 %v2491_v45, %v1919_v9 }
 0x20b   : > { %2086 = vst.msk [vmem:[%s3568_s20 + $0x38] sm:$0xff] %vm373_vm0, %v2054_v40  ;;  %v2506_v40 = vld [vmem:[%s2594_s9 + $0xb8] sm:$0xff] }
 0x20c   : > { %2085 = vst.msk [vmem:[%s3568_s20 + $0x30] sm:$0xff] %vm373_vm0, %v2053_v4  ;;  %v2507_v4 = vld [vmem:[%s2594_s9 + $0xb0] sm:$0xff] }
 0x211   : > { %v2391_v51 = vpop.f32.mrb[2].mxu1 }
 0x212   : > { %v1934_v1 = vadd.f32 %v2391_v51, %v3560_v37  ;;  %v1928_v43 = vpop.f32.mrb[3].mxu1 }
 0x213   : > { %v1929_v15 = vadd.f32 %v3560_v37, %v1928_v43 }
 0x214   : > { %v2056_v12 = vadd.f32 %v2492_v48, %v1934_v1 }
 0x215   : > { %v2055_v61 = vadd.f32 %v2493_v11, %v1929_v15 }
 0x216   : > { %2088 = vst.msk [vmem:[%s3568_s20 + $0x48] sm:$0xff] %vm373_vm0, %v2056_v12  ;;  %v2508_v12 = vld [vmem:[%s2594_s9 + $0xc8] sm:$0xff] }
 0x217   : > { %2087 = vst.msk [vmem:[%s3568_s20 + $0x40] sm:$0xff] %vm373_vm0, %v2055_v61  ;;  %v2509_v61 = vld [vmem:[%s2594_s9 + $0xc0] sm:$0xff] }
 0x21d   : > { %v2394_v6 = vpop.f32.mrb[4].mxu1 }
 0x21e   : > { %v1944_v41 = vadd.f32 %v2394_v6, %v3560_v37  ;;  %v1938_v39 = vpop.f32.mrb[5].mxu1 }
 0x21f   : > { %v1939_v38 = vadd.f32 %v3560_v37, %v1938_v39 }
 0x220   : > { %v2058_v57 = vadd.f32 %v2494_v7, %v1944_v41 }
 0x221   : > { %v2057_v33 = vadd.f32 %v2495_v22, %v1939_v38 }
 0x222   : > { %2090 = vst.msk [vmem:[%s3568_s20 + $0x58] sm:$0xff] %vm373_vm0, %v2058_v57  ;;  %v2510_v57 = vld [vmem:[%s2594_s9 + $0xd8] sm:$0xff] }
 0x223   : > { %2089 = vst.msk [vmem:[%s3568_s20 + $0x50] sm:$0xff] %vm373_vm0, %v2057_v33  ;;  %v2511_v33 = vld [vmem:[%s2594_s9 + $0xd0] sm:$0xff] }
 0x228   : > { %v2397_v17 = vpop.f32.mrb[6].mxu1 }
 0x229   : > { %v1954_v25 = vadd.f32 %v2397_v17, %v3560_v37  ;;  %v1948_v42 = vpop.f32.mrb[7].mxu1 }
 0x22a   : > { %v1949_v56 = vadd.f32 %v3560_v37, %v1948_v42 }
 0x22b   : > { %v2060_v2 = vadd.f32 %v2496_v26, %v1954_v25 }
 0x22c   : > { %v2059_v32 = vadd.f32 %v2497_v23, %v1949_v56 }
 0x22d   : > { %2092 = vst.msk [vmem:[%s3568_s20 + $0x68] sm:$0xff] %vm373_vm0, %v2060_v2  ;;  %v2512_v2 = vld [vmem:[%s2594_s9 + $0xe8] sm:$0xff] }
 0x22e   : > { %2091 = vst.msk [vmem:[%s3568_s20 + $0x60] sm:$0xff] %vm373_vm0, %v2059_v32  ;;  %v2513_v32 = vld [vmem:[%s2594_s9 + $0xe0] sm:$0xff] }
 0x233   : > { %v2400_v19 = vpop.f32.mrb[8].mxu1 }
 0x234   : > { %v1964_v52 = vadd.f32 %v2400_v19, %v3560_v37  ;;  %v1958_v36 = vpop.f32.mrb[9].mxu1 }
 0x235   : > { %v1959_v30 = vadd.f32 %v3560_v37, %v1958_v36 }
 0x236   : > { %v2062_v27 = vadd.f32 %v2498_v14, %v1964_v52 }
 0x237   : > { %v2061_v44 = vadd.f32 %v2499_v54, %v1959_v30 }
 0x238   : > { %2094 = vst.msk [vmem:[%s3568_s20 + $0x78] sm:$0xff] %vm373_vm0, %v2062_v27  ;;  %v2514_v27 = vld [vmem:[%s2594_s9 + $0xf8] sm:$0xff] }
 0x239   : > { %2093 = vst.msk [vmem:[%s3568_s20 + $0x70] sm:$0xff] %vm373_vm0, %v2061_v44  ;;  %v2515_v44 = vld [vmem:[%s2594_s9 + $0xf0] sm:$0xff] }
 0x23b   : > { %v2403_v59 = vpop.f32.mrb[10].mxu1 }
 0x23c   : > { %v1974_v49 = vadd.f32 %v2403_v59, %v3560_v37  ;;  %v1968_v8 = vpop.f32.mrb[11].mxu1 }
 0x23d   : > { %v1969_v47 = vadd.f32 %v3560_v37, %v1968_v8 }
 0x23e   : > { %v2064_v46 = vadd.f32 %v2500_v3, %v1974_v49 }
 0x23f   : > { %v2063_v13 = vadd.f32 %v2501_v34, %v1969_v47 }
 0x240   : > { %2096 = vst.msk [vmem:[%s3568_s20 + $0x88] sm:$0xff] %vm373_vm0, %v2064_v46 }
 0x241   : > { %2095 = vst.msk [vmem:[%s3568_s20 + $0x80] sm:$0xff] %vm373_vm0, %v2063_v13 }
 0x246   : > { %v2406_v60 = vpop.f32.mrb[12].mxu1 }
 0x247   : > { %v1984_v58 = vadd.f32 %v2406_v60, %v3560_v37  ;;  %v1978_v28 = vpop.f32.mrb[13].mxu1 }
 0x248   : > { %v1979_v5 = vadd.f32 %v3560_v37, %v1978_v28 }
 0x249   : > { %v2066_v20 = vadd.f32 %v2502_v62, %v1984_v58 }
 0x24a   : > { %v2065_v35 = vadd.f32 %v2503_v10, %v1979_v5 }
 0x24b   : > { %2098 = vst.msk [vmem:[%s3568_s20 + $0x98] sm:$0xff] %vm373_vm0, %v2066_v20 }
 0x24c   : > { %2097 = vst.msk [vmem:[%s3568_s20 + $0x90] sm:$0xff] %vm373_vm0, %v2065_v35 }
 0x251   : > { %v2409_v31 = vpop.f32.mrb[14].mxu1 }
 0x252   : > { %v1994_v24 = vadd.f32 %v2409_v31, %v3560_v37  ;;  %v1988_v55 = vpop.f32.mrb[15].mxu1 }
 0x253   : > { %v1989_v53 = vadd.f32 %v3560_v37, %v1988_v55 }
 0x254   : > { %v2068_v63 = vadd.f32 %v2504_v16, %v1994_v24 }
 0x255   : > { %v2067_v50 = vadd.f32 %v2505_v29, %v1989_v53 }
 0x256   : > { %2100 = vst.msk [vmem:[%s3568_s20 + $0xa8] sm:$0xff] %vm373_vm0, %v2068_v63 }
 0x257   : > { %2099 = vst.msk [vmem:[%s3568_s20 + $0xa0] sm:$0xff] %vm373_vm0, %v2067_v50 }
 0x259   : > { %v2412_v18 = vpop.f32.mrb[16].mxu1 }
 0x25a   : > { %v2004_v0 = vadd.f32 %v2412_v18, %v3560_v37  ;;  %v1998_v9 = vpop.f32.mrb[17].mxu1 }
 0x25b   : > { %v1999_v21 = vadd.f32 %v3560_v37, %v1998_v9 }
 0x25c   : > { %v2070_v45 = vadd.f32 %v2506_v40, %v2004_v0 }
 0x25d   : > { %v2069_v51 = vadd.f32 %v2507_v4, %v1999_v21 }
 0x25e   : > { %2102 = vst.msk [vmem:[%s3568_s20 + $0xb8] sm:$0xff] %vm373_vm0, %v2070_v45 }
 0x25f   : > { %2101 = vst.msk [vmem:[%s3568_s20 + $0xb0] sm:$0xff] %vm373_vm0, %v2069_v51 }
 0x264   : > { %v2415_v1 = vpop.f32.mrb[18].mxu1 }
 0x265   : > { %v2014_v43 = vadd.f32 %v2415_v1, %v3560_v37  ;;  %v2008_v15 = vpop.f32.mrb[19].mxu1 }
 0x266   : > { %v2009_v48 = vadd.f32 %v3560_v37, %v2008_v15 }
 0x267   : > { %v2072_v11 = vadd.f32 %v2508_v12, %v2014_v43 }
 0x268   : > { %v2071_v6 = vadd.f32 %v2509_v61, %v2009_v48 }
 0x269   : > { %2104 = vst.msk [vmem:[%s3568_s20 + $0xc8] sm:$0xff] %vm373_vm0, %v2072_v11 }
 0x26a   : > { %2103 = vst.msk [vmem:[%s3568_s20 + $0xc0] sm:$0xff] %vm373_vm0, %v2071_v6 }
 0x26f   : > { %v2418_v41 = vpop.f32.mrb[20].mxu1 }
 0x270   : > { %v2024_v39 = vadd.f32 %v2418_v41, %v3560_v37  ;;  %v2018_v38 = vpop.f32.mrb[21].mxu1 }
 0x271   : > { %v2019_v7 = vadd.f32 %v3560_v37, %v2018_v38 }
 0x272   : > { %v2074_v22 = vadd.f32 %v2510_v57, %v2024_v39 }
 0x273   : > { %v2073_v17 = vadd.f32 %v2511_v33, %v2019_v7 }
 0x274   : > { %2106 = vst.msk [vmem:[%s3568_s20 + $0xd8] sm:$0xff] %vm373_vm0, %v2074_v22 }
 0x275   : > { %2105 = vst.msk [vmem:[%s3568_s20 + $0xd0] sm:$0xff] %vm373_vm0, %v2073_v17 }
 0x277   : > { %v2421_v25 = vpop.f32.mrb[22].mxu1 }
 0x278   : > { %v2034_v42 = vadd.f32 %v2421_v25, %v3560_v37  ;;  %v2028_v56 = vpop.f32.mrb[23].mxu1 }
 0x279   : > { %v2029_v26 = vadd.f32 %v3560_v37, %v2028_v56 }
 0x27a   : > { %v2076_v23 = vadd.f32 %v2512_v2, %v2034_v42 }
 0x27b   : > { %v2075_v19 = vadd.f32 %v2513_v32, %v2029_v26 }
 0x27c   : > { %2108 = vst.msk [vmem:[%s3568_s20 + $0xe8] sm:$0xff] %vm373_vm0, %v2076_v23 }
 0x27d   : > { %2107 = vst.msk [vmem:[%s3568_s20 + $0xe0] sm:$0xff] %vm373_vm0, %v2075_v19 }
 0x282   : > { %v2424_v52 = vpop.f32.mrb[24].mxu1 }
 0x283   : > { %v2044_v36 = vadd.f32 %v2424_v52, %v3560_v37  ;;  %v2038_v30 = vpop.f32.mrb[25].mxu1 }
 0x284   : > { %v2039_v14 = vadd.f32 %v3560_v37, %v2038_v30 }
 0x285   : > { %v2078_v54 = vadd.f32 %v2514_v27, %v2044_v36 }
 0x286   : > { %v2077_v59 = vadd.f32 %v2515_v44, %v2039_v14 }
 0x287   : > { %2110 = vst.msk [vmem:[%s3568_s20 + $0xf8] sm:$0xff] %vm373_vm0, %v2078_v54 }
 0x288   : > { %2109 = vst.msk [vmem:[%s3568_s20 + $0xf0] sm:$0xff] %vm373_vm0, %v2077_v59 }
 0x289 PF: > { %s17_s24 = sadd.s32 1, %s2522_s24  }
 0x28a   : > { %p14_p4 = scmp.ge.s32.totalorder %s17_s24, 4  }
 0x28c   :  { %16 = sbr.rel (!%p14_p4) target bundleno = 1 (0x1), region = 80 }

</bundles_post_ra>
